<compile_context>
chip_gen: v7x
topology: tpu7x:2x2x1
jax: 0.10.0
libtpu: 0.0.40
codegen_flags: <defaults>
</compile_context>

<pallas_src>
import math

import jax
import jax.numpy as jnp
from jax import lax
from jax.experimental import pallas as pl
from jax.experimental.pallas import tpu as pltpu

_LN_EPS = 1e-5   # PyTorch nn.LayerNorm default
_SLOT = 128      # lane-aligned slot width inside the packed weight slab


# ------------------------------ kernel helpers ------------------------------

def _add_layernorm(res, x, gamma, beta, eps=_LN_EPS):
    """res + LayerNorm(x) * gamma + beta over the last axis (f32)."""
    mean = jnp.mean(x, axis=-1, keepdims=True)
    var = jnp.mean(jnp.square(x - mean), axis=-1, keepdims=True)
    xn = (x - mean) * lax.rsqrt(var + eps)
    return res + xn * gamma + beta


def _softmax_rows(s):
    s = s - jnp.max(s, axis=-1, keepdims=True)
    p = jnp.exp(s)
    # EUP reciprocal instead of VALU divide (~1e-3 rel error; swap for exact
    # division if bit-parity with PyTorch is required).
    return p * pl.reciprocal(jnp.sum(p, axis=-1, keepdims=True), approx=True)


def _heads_attend(q_all, k_all, v_all, *, bb, lq, lk, num_heads, head_dim):
    """Scaled-dot-product attention per (batch item, head).

    q_all [bb*lq, H*dh] (already scaled by 1/sqrt(dh) via the folded Wq),
    k_all / v_all [bb*lk, H*dh].  Returns the lane-concatenated head outputs
    [bb*lq, H*dh] ready for a single fused output projection.
    """
    out_rows = []
    for b in range(bb):
        qb = q_all[b * lq:(b + 1) * lq]
        kb = k_all[b * lk:(b + 1) * lk]
        vb = v_all[b * lk:(b + 1) * lk]
        heads = []
        for h in range(num_heads):
            lo, hi = h * head_dim, (h + 1) * head_dim
            s = lax.dot_general(qb[:, lo:hi], kb[:, lo:hi],
                                (((1,), (1,)), ((), ())),
                                preferred_element_type=jnp.float32)   # [lq, lk]
            p = _softmax_rows(s)
            heads.append(jnp.dot(p, vb[:, lo:hi],
                                 preferred_element_type=jnp.float32))  # [lq, dh]
        out_rows.append(jnp.concatenate(heads, axis=-1))               # [lq, H*dh]
    return jnp.concatenate(out_rows, axis=0)                           # [bb*lq, H*dh]


def _make_kernel(bb, lq, lk, d, d_ff, num_heads):
    dh = d // num_heads

    def kernel(q_ref, k_ref, v_ref, w_ref, b_ref, o_ref):
        # Flatten the folded batch so projections/FFN/LN see [bb*L, D].
        xq = q_ref[...].reshape(bb * lq, d).astype(jnp.float32)
        xk = k_ref[...].reshape(bb * lk, d).astype(jnp.float32)
        xv = v_ref[...].reshape(bb * lk, d).astype(jnp.float32)

        # --- static views into the two packed slabs (lane-aligned slots) ---
        w_sa_qkv = w_ref[:d, 0 * _SLOT:0 * _SLOT + 3 * d]   # [D, 3D] (q scaled)
        w_ca_q = w_ref[:d, 1 * _SLOT:1 * _SLOT + d]         # [D, D]  (scaled)
        w_ca_k = w_ref[:d, 2 * _SLOT:2 * _SLOT + d]
        w_ca_v = w_ref[:d, 3 * _SLOT:3 * _SLOT + d]
        w_sa_o = w_ref[:d, 4 * _SLOT:4 * _SLOT + d]
        w_ca_o = w_ref[:d, 5 * _SLOT:5 * _SLOT + d]
        w_ff1 = w_ref[:d, 6 * _SLOT:6 * _SLOT + d_ff]       # [D, Dff]
        w_ff2 = w_ref[:d_ff, 7 * _SLOT:7 * _SLOT + d]       # [Dff, D]

        b_sa_qkv = b_ref[0:1, 0:3 * d]
        b_ca_q = b_ref[1:2, 0:d]
        b_ca_k = b_ref[2:3, 0:d]
        b_ca_v = b_ref[3:4, 0:d]
        b_sa_o = b_ref[4:5, 0:d]
        b_ca_o = b_ref[5:6, 0:d]
        ln1_g = b_ref[6:7, 0:d]
        ln1_b = b_ref[7:8, 0:d]
        ln2_g = b_ref[8:9, 0:d]
        ln2_b = b_ref[9:10, 0:d]
        ln3_g = b_ref[10:11, 0:d]
        ln3_b = b_ref[11:12, 0:d]
        b_ff1 = b_ref[12:13, 0:d_ff]
        b_ff2 = b_ref[13:14, 0:d]

        # ---- self-attention: one fused QKV matmul (q == k == v) ----
        qkv = jnp.dot(xq, w_sa_qkv, preferred_element_type=jnp.float32) + b_sa_qkv
        ctx = _heads_attend(qkv[:, 0:d], qkv[:, d:2 * d], qkv[:, 2 * d:3 * d],
                            bb=bb, lq=lq, lk=lq, num_heads=num_heads, head_dim=dh)
        sa_out = jnp.dot(ctx, w_sa_o, preferred_element_type=jnp.float32) + b_sa_o
        # dropout1 = identity (eval mode)
        score1 = _add_layernorm(xq, sa_out, ln1_g, ln1_b)

        # ---- cross-attention: q from score1, k/v from the k/v inputs ----
        qc = jnp.dot(score1, w_ca_q, preferred_element_type=jnp.float32) + b_ca_q
        kc = jnp.dot(xk, w_ca_k, preferred_element_type=jnp.float32) + b_ca_k
        vc = jnp.dot(xv, w_ca_v, preferred_element_type=jnp.float32) + b_ca_v
        ctx2 = _heads_attend(qc, kc, vc, bb=bb, lq=lq, lk=lk,
                             num_heads=num_heads, head_dim=dh)
        ca_out = jnp.dot(ctx2, w_ca_o, preferred_element_type=jnp.float32) + b_ca_o
        # dropout2 = identity (eval mode)
        score2 = _add_layernorm(score1, ca_out, ln2_g, ln2_b)

        # ---- feed-forward: Linear -> ReLU -> Linear ----
        h1 = jnp.maximum(
            jnp.dot(score2, w_ff1, preferred_element_type=jnp.float32) + b_ff1, 0.0)
        ff = jnp.dot(h1, w_ff2, preferred_element_type=jnp.float32) + b_ff2
        score = _add_layernorm(score2, ff, ln3_g, ln3_b)

        o_ref[...] = score.reshape(bb, lq, d).astype(o_ref.dtype)

    return kernel


# ------------------------------ module wrapper ------------------------------

def _default_batch_block(batch):
    """Fold the whole batch on single-TC chips; keep a 2-way parallel grid on v7x."""
    kind = ""
    try:
        kind = jax.devices()[0].device_kind.lower()
    except Exception:
        pass
    if "v7" in kind and batch >= 2:
        return max(1, batch // 2)
    return batch


def attn_part_forward(q, k, v, packed, *, num_heads, batch_block=None):
    B, Lq, D = q.shape
    Lk = k.shape[1]
    if batch_block is None:
        batch_block = _default_batch_block(B)
    assert B % batch_block == 0, (B, batch_block)

    w_slab = packed["w_slab"]
    b_slab = packed["b_slab"]
    d_ff = packed["d_ff"]

    kernel = _make_kernel(batch_block, Lq, Lk, D, d_ff, num_heads)
    grid = (B // batch_block,)

    in_specs = [
        pl.BlockSpec((batch_block, Lq, D), lambda i: (i, 0, 0)),
        pl.BlockSpec((batch_block, Lk, D), lambda i: (i, 0, 0)),
        pl.BlockSpec((batch_block, Lk, D), lambda i: (i, 0, 0)),
        # Constant block index -> the slabs stay resident in VMEM across steps.
        pl.BlockSpec(w_slab.shape, lambda i: (0, 0)),
        pl.BlockSpec(b_slab.shape, lambda i: (0, 0)),
    ]

    return pl.pallas_call(
        kernel,
        out_shape=jax.ShapeDtypeStruct((B, Lq, D), q.dtype),
        grid=grid,
        in_specs=in_specs,
        out_specs=pl.BlockSpec((batch_block, Lq, D), lambda i: (i, 0, 0)),
        compiler_params=pltpu.CompilerParams(
            dimension_semantics=("parallel",)),
    )(q, k, v, w_slab, b_slab)


# -------------------------------- param init --------------------------------

def _init_linear(key, din, dout):
    kw, kb = jax.random.split(key)
    w = jax.random.normal(kw, (din, dout), jnp.float32) / math.sqrt(din)
    b = jax.random.normal(kb, (1, dout), jnp.float32) * 0.01
    return w, b


def _init_mha(key, d):
    ks = jax.random.split(key, 4)
    wq, bq = _init_linear(ks[0], d, d)
    wk, bk = _init_linear(ks[1], d, d)
    wv, bv = _init_linear(ks[2], d, d)
    wo, bo = _init_linear(ks[3], d, d)
    return dict(wq=wq, bq=bq, wk=wk, bk=bk, wv=wv, bv=bv, wo=wo, bo=bo)


def init_params(key, d_model, d_ff, num_heads):
    assert d_model % num_heads == 0
    ks = jax.random.split(key, 4)
    w1, b1 = _init_linear(ks[2], d_model, d_ff)
    w2, b2 = _init_linear(ks[3], d_ff, d_model)
    ones = jnp.ones((1, d_model), jnp.float32)
    zeros = jnp.zeros((1, d_model), jnp.float32)
    return dict(
        self_attn=_init_mha(ks[0], d_model),
        cross_attn=_init_mha(ks[1], d_model),
        ln1_g=ones, ln1_b=zeros,
        ln2_g=ones, ln2_b=zeros,
        ln3_g=ones, ln3_b=zeros,
        ffd_w1=w1, ffd_b1=b1, ffd_w2=w2, ffd_b2=b2,
    )


def pack_params(params, num_heads):
    """One-time offline packing: 2 slabs + folded 1/sqrt(dh) scale."""
    sa, ca = params["self_attn"], params["cross_attn"]
    d = params["ffd_w1"].shape[0]
    d_ff = params["ffd_w1"].shape[1]
    dh = d // num_heads
    scale = 1.0 / math.sqrt(dh)
    assert 3 * d <= _SLOT and d_ff <= _SLOT, "slab slot width exceeded"

    rows = ((max(d, d_ff) + 7) // 8) * 8
    w_slab = jnp.zeros((rows, 8 * _SLOT), jnp.float32)
    w_slab = w_slab.at[:d, 0:3 * d].set(
        jnp.concatenate([sa["wq"] * scale, sa["wk"], sa["wv"]], axis=1))
    w_slab = w_slab.at[:d, 1 * _SLOT:1 * _SLOT + d].set(ca["wq"] * scale)
    w_slab = w_slab.at[:d, 2 * _SLOT:2 * _SLOT + d].set(ca["wk"])
    w_slab = w_slab.at[:d, 3 * _SLOT:3 * _SLOT + d].set(ca["wv"])
    w_slab = w_slab.at[:d, 4 * _SLOT:4 * _SLOT + d].set(sa["wo"])
    w_slab = w_slab.at[:d, 5 * _SLOT:5 * _SLOT + d].set(ca["wo"])
    w_slab = w_slab.at[:d, 6 * _SLOT:6 * _SLOT + d_ff].set(params["ffd_w1"])
    w_slab = w_slab.at[:d_ff, 7 * _SLOT:7 * _SLOT + d].set(params["ffd_w2"])

    b_slab = jnp.zeros((16, _SLOT), jnp.float32)
    b_slab = b_slab.at[0, 0:3 * d].set(
        jnp.concatenate([sa["bq"][0] * scale, sa["bk"][0], sa["bv"][0]]))
    b_slab = b_slab.at[1, 0:d].set(ca["bq"][0] * scale)
    b_slab = b_slab.at[2, 0:d].set(ca["bk"][0])
    b_slab = b_slab.at[3, 0:d].set(ca["bv"][0])
    b_slab = b_slab.at[4, 0:d].set(sa["bo"][0])
    b_slab = b_slab.at[5, 0:d].set(ca["bo"][0])
    b_slab = b_slab.at[6, 0:d].set(params["ln1_g"][0])
    b_slab = b_slab.at[7, 0:d].set(params["ln1_b"][0])
    b_slab = b_slab.at[8, 0:d].set(params["ln2_g"][0])
    b_slab = b_slab.at[9, 0:d].set(params["ln2_b"][0])
    b_slab = b_slab.at[10, 0:d].set(params["ln3_g"][0])
    b_slab = b_slab.at[11, 0:d].set(params["ln3_b"][0])
    b_slab = b_slab.at[12, 0:d_ff].set(params["ffd_b1"][0])
    b_slab = b_slab.at[13, 0:d].set(params["ffd_b2"][0])

    return dict(w_slab=w_slab, b_slab=b_slab, d_ff=int(d_ff))


# --------------------------- pure-JAX reference -----------------------------

def _attn_part_reference(q, k, v, params, num_heads):
    D = q.shape[-1]
    H = num_heads
    dh = D // H

    def mha(xq, xk, xv, p):
        B, Lq, _ = xq.shape
        Lk = xk.shape[1]
        qp = (xq @ p["wq"] + p["bq"]).reshape(B, Lq, H, dh).transpose(0, 2, 1, 3)
        kp = (xk @ p["wk"] + p["bk"]).reshape(B, Lk, H, dh).transpose(0, 2, 1, 3)
        vp = (xv @ p["wv"] + p["bv"]).reshape(B, Lk, H, dh).transpose(0, 2, 1, 3)
        s = jnp.einsum("bhqd,bhkd->bhqk", qp, kp) / math.sqrt(dh)
        a = jax.nn.softmax(s, axis=-1)
        o = jnp.einsum("bhqk,bhkd->bhqd", a, vp).transpose(0, 2, 1, 3).reshape(B, Lq, D)
        return o @ p["wo"] + p["bo"]

    def ln(x, g, b):
        mean = jnp.mean(x, axis=-1, keepdims=True)
        var = jnp.mean((x - mean) ** 2, axis=-1, keepdims=True)
        return (x - mean) / jnp.sqrt(var + _LN_EPS) * g + b

    sa = mha(q, q, q, params["self_attn"])
    score1 = q + ln(sa, params["ln1_g"], params["ln1_b"])
    ca = mha(score1, k, v, params["cross_attn"])
    score2 = score1 + ln(ca, params["ln2_g"], params["ln2_b"])
    h1 = jnp.maximum(score2 @ params["ffd_w1"] + params["ffd_b1"], 0.0)
    ff = h1 @ params["ffd_w2"] + params["ffd_b2"]
    return score2 + ln(ff, params["ln3_g"], params["ln3_b"])


# ----------------------------------- main ------------------------------------

if __name__ == "__main__":
    B, Lq, Lk, D, H, Dff = 2, 8, 16, 32, 4, 64

    key = jax.random.PRNGKey(0)
    kq, kk, kv, kp = jax.random.split(key, 4)
    q = jax.random.normal(kq, (B, Lq, D), jnp.float32)
    k = jax.random.normal(kk, (B, Lk, D), jnp.float32)
    v = jax.random.normal(kv, (B, Lk, D), jnp.float32)

    params = init_params(kp, D, Dff, num_heads=H)
    packed = pack_params(params, num_heads=H)

    out = attn_part_forward(q, k, v, packed, num_heads=H)
    out = jax.block_until_ready(out)

    assert out.shape == (B, Lq, D), out.shape
    assert bool(jnp.all(jnp.isfinite(out)))
    ref = _attn_part_reference(q, k, v, params, num_heads=H)
    assert bool(jnp.allclose(out, ref, rtol=1e-2, atol=1e-2)), (
        float(jnp.max(jnp.abs(out - ref))))
    print("KERNEL_OK")
</pallas_src>

<mosaic_0001>
module attributes {stable_mosaic.version = 11 : i64} {
  func.func @kernel(%arg0: i32, %arg1: memref<2x8x32xf32, #tpu.memory_space<vmem>>, %arg2: memref<2x16x32xf32, #tpu.memory_space<vmem>>, %arg3: memref<2x16x32xf32, #tpu.memory_space<vmem>>, %arg4: memref<64x1024xf32, #tpu.memory_space<vmem>>, %arg5: memref<16x128xf32, #tpu.memory_space<vmem>>, %arg6: memref<2x8x32xf32, #tpu.memory_space<vmem>>) attributes {dimension_semantics = [#tpu.dimension_semantics<parallel>], iteration_bounds = array<i64: 1>, scalar_prefetch = 0 : i64, scratch_operands = 0 : i64, tpu.core_type = #tpu.core_type<tc>, window_params = [{transform_indices = @transform_0, window_bounds = array<i64: 2, 8, 32>}, {transform_indices = @transform_1, window_bounds = array<i64: 2, 16, 32>}, {transform_indices = @transform_2, window_bounds = array<i64: 2, 16, 32>}, {pipeline_mode = #tpu.pipeline_mode<synchronous>, transform_indices = @transform_3, window_bounds = array<i64: 64, 1024>}, {pipeline_mode = #tpu.pipeline_mode<synchronous>, transform_indices = @transform_4, window_bounds = array<i64: 16, 128>}, {transform_indices = @transform_5, window_bounds = array<i64: 2, 8, 32>}]} {
    %c0 = arith.constant 0 : index
    %c0_0 = arith.constant 0 : index
    %c0_1 = arith.constant 0 : index
    %0 = vector.load %arg1[%c0, %c0_0, %c0_1] : memref<2x8x32xf32, #tpu.memory_space<vmem>>, vector<2x8x32xf32>
    %1 = vector.shape_cast %0 : vector<2x8x32xf32> to vector<16x32xf32>
    %c0_2 = arith.constant 0 : index
    %c0_3 = arith.constant 0 : index
    %c0_4 = arith.constant 0 : index
    %2 = vector.load %arg2[%c0_2, %c0_3, %c0_4] : memref<2x16x32xf32, #tpu.memory_space<vmem>>, vector<2x16x32xf32>
    %3 = vector.shape_cast %2 : vector<2x16x32xf32> to vector<32x32xf32>
    %c0_5 = arith.constant 0 : index
    %c0_6 = arith.constant 0 : index
    %c0_7 = arith.constant 0 : index
    %4 = vector.load %arg3[%c0_5, %c0_6, %c0_7] : memref<2x16x32xf32, #tpu.memory_space<vmem>>, vector<2x16x32xf32>
    %5 = vector.shape_cast %4 : vector<2x16x32xf32> to vector<32x32xf32>
    %c0_8 = arith.constant 0 : index
    %c0_9 = arith.constant 0 : index
    %6 = vector.load %arg4[%c0_8, %c0_9] : memref<64x1024xf32, #tpu.memory_space<vmem>>, vector<32x96xf32>
    %c0_10 = arith.constant 0 : index
    %c128 = arith.constant 128 : index
    %7 = vector.load %arg4[%c0_10, %c128] : memref<64x1024xf32, #tpu.memory_space<vmem>>, vector<32x32xf32>
    %c0_11 = arith.constant 0 : index
    %c256 = arith.constant 256 : index
    %8 = vector.load %arg4[%c0_11, %c256] : memref<64x1024xf32, #tpu.memory_space<vmem>>, vector<32x32xf32>
    %c0_12 = arith.constant 0 : index
    %c384 = arith.constant 384 : index
    %9 = vector.load %arg4[%c0_12, %c384] : memref<64x1024xf32, #tpu.memory_space<vmem>>, vector<32x32xf32>
    %c0_13 = arith.constant 0 : index
    %c512 = arith.constant 512 : index
    %10 = vector.load %arg4[%c0_13, %c512] : memref<64x1024xf32, #tpu.memory_space<vmem>>, vector<32x32xf32>
    %c0_14 = arith.constant 0 : index
    %c640 = arith.constant 640 : index
    %11 = vector.load %arg4[%c0_14, %c640] : memref<64x1024xf32, #tpu.memory_space<vmem>>, vector<32x32xf32>
    %c0_15 = arith.constant 0 : index
    %c768 = arith.constant 768 : index
    %12 = vector.load %arg4[%c0_15, %c768] : memref<64x1024xf32, #tpu.memory_space<vmem>>, vector<32x64xf32>
    %c0_16 = arith.constant 0 : index
    %c896 = arith.constant 896 : index
    %13 = vector.load %arg4[%c0_16, %c896] : memref<64x1024xf32, #tpu.memory_space<vmem>>, vector<64x32xf32>
    %c0_17 = arith.constant 0 : index
    %c0_18 = arith.constant 0 : index
    %14 = vector.load %arg5[%c0_17, %c0_18] : memref<16x128xf32, #tpu.memory_space<vmem>>, vector<1x96xf32>
    %c1 = arith.constant 1 : index
    %c0_19 = arith.constant 0 : index
    %15 = vector.load %arg5[%c1, %c0_19] : memref<16x128xf32, #tpu.memory_space<vmem>>, vector<1x32xf32>
    %c2 = arith.constant 2 : index
    %c0_20 = arith.constant 0 : index
    %16 = vector.load %arg5[%c2, %c0_20] : memref<16x128xf32, #tpu.memory_space<vmem>>, vector<1x32xf32>
    %c3 = arith.constant 3 : index
    %c0_21 = arith.constant 0 : index
    %17 = vector.load %arg5[%c3, %c0_21] : memref<16x128xf32, #tpu.memory_space<vmem>>, vector<1x32xf32>
    %c4 = arith.constant 4 : index
    %c0_22 = arith.constant 0 : index
    %18 = vector.load %arg5[%c4, %c0_22] : memref<16x128xf32, #tpu.memory_space<vmem>>, vector<1x32xf32>
    %c5 = arith.constant 5 : index
    %c0_23 = arith.constant 0 : index
    %19 = vector.load %arg5[%c5, %c0_23] : memref<16x128xf32, #tpu.memory_space<vmem>>, vector<1x32xf32>
    %c6 = arith.constant 6 : index
    %c0_24 = arith.constant 0 : index
    %20 = vector.load %arg5[%c6, %c0_24] : memref<16x128xf32, #tpu.memory_space<vmem>>, vector<1x32xf32>
    %c7 = arith.constant 7 : index
    %c0_25 = arith.constant 0 : index
    %21 = vector.load %arg5[%c7, %c0_25] : memref<16x128xf32, #tpu.memory_space<vmem>>, vector<1x32xf32>
    %c8 = arith.constant 8 : index
    %c0_26 = arith.constant 0 : index
    %22 = vector.load %arg5[%c8, %c0_26] : memref<16x128xf32, #tpu.memory_space<vmem>>, vector<1x32xf32>
    %c9 = arith.constant 9 : index
    %c0_27 = arith.constant 0 : index
    %23 = vector.load %arg5[%c9, %c0_27] : memref<16x128xf32, #tpu.memory_space<vmem>>, vector<1x32xf32>
    %c10 = arith.constant 10 : index
    %c0_28 = arith.constant 0 : index
    %24 = vector.load %arg5[%c10, %c0_28] : memref<16x128xf32, #tpu.memory_space<vmem>>, vector<1x32xf32>
    %c11 = arith.constant 11 : index
    %c0_29 = arith.constant 0 : index
    %25 = vector.load %arg5[%c11, %c0_29] : memref<16x128xf32, #tpu.memory_space<vmem>>, vector<1x32xf32>
    %c12 = arith.constant 12 : index
    %c0_30 = arith.constant 0 : index
    %26 = vector.load %arg5[%c12, %c0_30] : memref<16x128xf32, #tpu.memory_space<vmem>>, vector<1x64xf32>
    %c13 = arith.constant 13 : index
    %c0_31 = arith.constant 0 : index
    %27 = vector.load %arg5[%c13, %c0_31] : memref<16x128xf32, #tpu.memory_space<vmem>>, vector<1x32xf32>
    %cst = arith.constant dense<0.000000e+00> : vector<16x96xf32>
    %28 = tpu.matmul %1, %6, %cst {dimension_numbers = #tpu.dot_dimension_numbers<[1], [0], [0], [1], [0, 0, 1, 1], [], []>} : vector<16x32xf32>, vector<32x96xf32>, vector<16x96xf32> -> vector<16x96xf32>
    %29 = vector.broadcast %14 : vector<1x96xf32> to vector<16x96xf32>
    %30 = arith.addf %28, %29 : vector<16x96xf32>
    %31 = vector.extract_strided_slice %30 {offsets = [0, 0], sizes = [16, 32], strides = [1, 1]} : vector<16x96xf32> to vector<16x32xf32>
    %32 = vector.extract_strided_slice %30 {offsets = [0, 32], sizes = [16, 32], strides = [1, 1]} : vector<16x96xf32> to vector<16x32xf32>
    %33 = vector.extract_strided_slice %30 {offsets = [0, 64], sizes = [16, 32], strides = [1, 1]} : vector<16x96xf32> to vector<16x32xf32>
    %34 = vector.extract_strided_slice %31 {offsets = [0, 0], sizes = [8, 32], strides = [1, 1]} : vector<16x32xf32> to vector<8x32xf32>
    %35 = vector.extract_strided_slice %32 {offsets = [0, 0], sizes = [8, 32], strides = [1, 1]} : vector<16x32xf32> to vector<8x32xf32>
    %36 = vector.extract_strided_slice %33 {offsets = [0, 0], sizes = [8, 32], strides = [1, 1]} : vector<16x32xf32> to vector<8x32xf32>
    %37 = vector.extract_strided_slice %34 {offsets = [0, 0], sizes = [8, 8], strides = [1, 1]} : vector<8x32xf32> to vector<8x8xf32>
    %38 = vector.extract_strided_slice %35 {offsets = [0, 0], sizes = [8, 8], strides = [1, 1]} : vector<8x32xf32> to vector<8x8xf32>
    %cst_32 = arith.constant dense<0.000000e+00> : vector<8x8xf32>
    %39 = tpu.matmul %37, %38, %cst_32 {dimension_numbers = #tpu.dot_dimension_numbers<[1], [1], [0], [0], [0, 0, 1, 0], [], []>} : vector<8x8xf32>, vector<8x8xf32>, vector<8x8xf32> -> vector<8x8xf32>
    %cst_33 = arith.constant dense<0xFF800000> : vector<8xf32>
    %40 = vector.multi_reduction <maximumf>, %39, %cst_33 [1] : vector<8x8xf32> to vector<8xf32>
    %41 = vector.shape_cast %40 : vector<8xf32> to vector<8x1xf32>
    %42 = vector.broadcast %41 : vector<8x1xf32> to vector<8x8xf32>
    %43 = arith.subf %39, %42 : vector<8x8xf32>
    %44 = math.exp %43 : vector<8x8xf32>
    %cst_34 = arith.constant dense<0.000000e+00> : vector<8xf32>
    %45 = vector.multi_reduction <add>, %44, %cst_34 [1] : vector<8x8xf32> to vector<8xf32>
    %46 = vector.shape_cast %45 : vector<8xf32> to vector<8x1xf32>
    %47 = tpu.reciprocal %46 {approx = true} : vector<8x1xf32> -> vector<8x1xf32>
    %48 = vector.broadcast %47 : vector<8x1xf32> to vector<8x8xf32>
    %49 = arith.mulf %44, %48 : vector<8x8xf32>
    %50 = vector.extract_strided_slice %36 {offsets = [0, 0], sizes = [8, 8], strides = [1, 1]} : vector<8x32xf32> to vector<8x8xf32>
    %cst_35 = arith.constant dense<0.000000e+00> : vector<8x8xf32>
    %51 = tpu.matmul %49, %50, %cst_35 {dimension_numbers = #tpu.dot_dimension_numbers<[1], [0], [0], [1], [0, 0, 1, 1], [], []>} : vector<8x8xf32>, vector<8x8xf32>, vector<8x8xf32> -> vector<8x8xf32>
    %52 = vector.extract_strided_slice %34 {offsets = [0, 8], sizes = [8, 8], strides = [1, 1]} : vector<8x32xf32> to vector<8x8xf32>
    %53 = vector.extract_strided_slice %35 {offsets = [0, 8], sizes = [8, 8], strides = [1, 1]} : vector<8x32xf32> to vector<8x8xf32>
    %cst_36 = arith.constant dense<0.000000e+00> : vector<8x8xf32>
    %54 = tpu.matmul %52, %53, %cst_36 {dimension_numbers = #tpu.dot_dimension_numbers<[1], [1], [0], [0], [0, 0, 1, 0], [], []>} : vector<8x8xf32>, vector<8x8xf32>, vector<8x8xf32> -> vector<8x8xf32>
    %cst_37 = arith.constant dense<0xFF800000> : vector<8xf32>
    %55 = vector.multi_reduction <maximumf>, %54, %cst_37 [1] : vector<8x8xf32> to vector<8xf32>
    %56 = vector.shape_cast %55 : vector<8xf32> to vector<8x1xf32>
    %57 = vector.broadcast %56 : vector<8x1xf32> to vector<8x8xf32>
    %58 = arith.subf %54, %57 : vector<8x8xf32>
    %59 = math.exp %58 : vector<8x8xf32>
    %cst_38 = arith.constant dense<0.000000e+00> : vector<8xf32>
    %60 = vector.multi_reduction <add>, %59, %cst_38 [1] : vector<8x8xf32> to vector<8xf32>
    %61 = vector.shape_cast %60 : vector<8xf32> to vector<8x1xf32>
    %62 = tpu.reciprocal %61 {approx = true} : vector<8x1xf32> -> vector<8x1xf32>
    %63 = vector.broadcast %62 : vector<8x1xf32> to vector<8x8xf32>
    %64 = arith.mulf %59, %63 : vector<8x8xf32>
    %65 = vector.extract_strided_slice %36 {offsets = [0, 8], sizes = [8, 8], strides = [1, 1]} : vector<8x32xf32> to vector<8x8xf32>
    %cst_39 = arith.constant dense<0.000000e+00> : vector<8x8xf32>
    %66 = tpu.matmul %64, %65, %cst_39 {dimension_numbers = #tpu.dot_dimension_numbers<[1], [0], [0], [1], [0, 0, 1, 1], [], []>} : vector<8x8xf32>, vector<8x8xf32>, vector<8x8xf32> -> vector<8x8xf32>
    %67 = vector.extract_strided_slice %34 {offsets = [0, 16], sizes = [8, 8], strides = [1, 1]} : vector<8x32xf32> to vector<8x8xf32>
    %68 = vector.extract_strided_slice %35 {offsets = [0, 16], sizes = [8, 8], strides = [1, 1]} : vector<8x32xf32> to vector<8x8xf32>
    %cst_40 = arith.constant dense<0.000000e+00> : vector<8x8xf32>
    %69 = tpu.matmul %67, %68, %cst_40 {dimension_numbers = #tpu.dot_dimension_numbers<[1], [1], [0], [0], [0, 0, 1, 0], [], []>} : vector<8x8xf32>, vector<8x8xf32>, vector<8x8xf32> -> vector<8x8xf32>
    %cst_41 = arith.constant dense<0xFF800000> : vector<8xf32>
    %70 = vector.multi_reduction <maximumf>, %69, %cst_41 [1] : vector<8x8xf32> to vector<8xf32>
    %71 = vector.shape_cast %70 : vector<8xf32> to vector<8x1xf32>
    %72 = vector.broadcast %71 : vector<8x1xf32> to vector<8x8xf32>
    %73 = arith.subf %69, %72 : vector<8x8xf32>
    %74 = math.exp %73 : vector<8x8xf32>
    %cst_42 = arith.constant dense<0.000000e+00> : vector<8xf32>
    %75 = vector.multi_reduction <add>, %74, %cst_42 [1] : vector<8x8xf32> to vector<8xf32>
    %76 = vector.shape_cast %75 : vector<8xf32> to vector<8x1xf32>
    %77 = tpu.reciprocal %76 {approx = true} : vector<8x1xf32> -> vector<8x1xf32>
    %78 = vector.broadcast %77 : vector<8x1xf32> to vector<8x8xf32>
    %79 = arith.mulf %74, %78 : vector<8x8xf32>
    %80 = vector.extract_strided_slice %36 {offsets = [0, 16], sizes = [8, 8], strides = [1, 1]} : vector<8x32xf32> to vector<8x8xf32>
    %cst_43 = arith.constant dense<0.000000e+00> : vector<8x8xf32>
    %81 = tpu.matmul %79, %80, %cst_43 {dimension_numbers = #tpu.dot_dimension_numbers<[1], [0], [0], [1], [0, 0, 1, 1], [], []>} : vector<8x8xf32>, vector<8x8xf32>, vector<8x8xf32> -> vector<8x8xf32>
    %82 = vector.extract_strided_slice %34 {offsets = [0, 24], sizes = [8, 8], strides = [1, 1]} : vector<8x32xf32> to vector<8x8xf32>
    %83 = vector.extract_strided_slice %35 {offsets = [0, 24], sizes = [8, 8], strides = [1, 1]} : vector<8x32xf32> to vector<8x8xf32>
    %cst_44 = arith.constant dense<0.000000e+00> : vector<8x8xf32>
    %84 = tpu.matmul %82, %83, %cst_44 {dimension_numbers = #tpu.dot_dimension_numbers<[1], [1], [0], [0], [0, 0, 1, 0], [], []>} : vector<8x8xf32>, vector<8x8xf32>, vector<8x8xf32> -> vector<8x8xf32>
    %cst_45 = arith.constant dense<0xFF800000> : vector<8xf32>
    %85 = vector.multi_reduction <maximumf>, %84, %cst_45 [1] : vector<8x8xf32> to vector<8xf32>
    %86 = vector.shape_cast %85 : vector<8xf32> to vector<8x1xf32>
    %87 = vector.broadcast %86 : vector<8x1xf32> to vector<8x8xf32>
    %88 = arith.subf %84, %87 : vector<8x8xf32>
    %89 = math.exp %88 : vector<8x8xf32>
    %cst_46 = arith.constant dense<0.000000e+00> : vector<8xf32>
    %90 = vector.multi_reduction <add>, %89, %cst_46 [1] : vector<8x8xf32> to vector<8xf32>
    %91 = vector.shape_cast %90 : vector<8xf32> to vector<8x1xf32>
    %92 = tpu.reciprocal %91 {approx = true} : vector<8x1xf32> -> vector<8x1xf32>
    %93 = vector.broadcast %92 : vector<8x1xf32> to vector<8x8xf32>
    %94 = arith.mulf %89, %93 : vector<8x8xf32>
    %95 = vector.extract_strided_slice %36 {offsets = [0, 24], sizes = [8, 8], strides = [1, 1]} : vector<8x32xf32> to vector<8x8xf32>
    %cst_47 = arith.constant dense<0.000000e+00> : vector<8x8xf32>
    %96 = tpu.matmul %94, %95, %cst_47 {dimension_numbers = #tpu.dot_dimension_numbers<[1], [0], [0], [1], [0, 0, 1, 1], [], []>} : vector<8x8xf32>, vector<8x8xf32>, vector<8x8xf32> -> vector<8x8xf32>
    %97 = tpu.concatenate %51, %66, %81, %96 in 1 : vector<8x8xf32>, vector<8x8xf32>, vector<8x8xf32>, vector<8x8xf32> -> vector<8x32xf32>
    %98 = vector.extract_strided_slice %31 {offsets = [8, 0], sizes = [8, 32], strides = [1, 1]} : vector<16x32xf32> to vector<8x32xf32>
    %99 = vector.extract_strided_slice %32 {offsets = [8, 0], sizes = [8, 32], strides = [1, 1]} : vector<16x32xf32> to vector<8x32xf32>
    %100 = vector.extract_strided_slice %33 {offsets = [8, 0], sizes = [8, 32], strides = [1, 1]} : vector<16x32xf32> to vector<8x32xf32>
    %101 = vector.extract_strided_slice %98 {offsets = [0, 0], sizes = [8, 8], strides = [1, 1]} : vector<8x32xf32> to vector<8x8xf32>
    %102 = vector.extract_strided_slice %99 {offsets = [0, 0], sizes = [8, 8], strides = [1, 1]} : vector<8x32xf32> to vector<8x8xf32>
    %cst_48 = arith.constant dense<0.000000e+00> : vector<8x8xf32>
    %103 = tpu.matmul %101, %102, %cst_48 {dimension_numbers = #tpu.dot_dimension_numbers<[1], [1], [0], [0], [0, 0, 1, 0], [], []>} : vector<8x8xf32>, vector<8x8xf32>, vector<8x8xf32> -> vector<8x8xf32>
    %cst_49 = arith.constant dense<0xFF800000> : vector<8xf32>
    %104 = vector.multi_reduction <maximumf>, %103, %cst_49 [1] : vector<8x8xf32> to vector<8xf32>
    %105 = vector.shape_cast %104 : vector<8xf32> to vector<8x1xf32>
    %106 = vector.broadcast %105 : vector<8x1xf32> to vector<8x8xf32>
    %107 = arith.subf %103, %106 : vector<8x8xf32>
    %108 = math.exp %107 : vector<8x8xf32>
    %cst_50 = arith.constant dense<0.000000e+00> : vector<8xf32>
    %109 = vector.multi_reduction <add>, %108, %cst_50 [1] : vector<8x8xf32> to vector<8xf32>
    %110 = vector.shape_cast %109 : vector<8xf32> to vector<8x1xf32>
    %111 = tpu.reciprocal %110 {approx = true} : vector<8x1xf32> -> vector<8x1xf32>
    %112 = vector.broadcast %111 : vector<8x1xf32> to vector<8x8xf32>
    %113 = arith.mulf %108, %112 : vector<8x8xf32>
    %114 = vector.extract_strided_slice %100 {offsets = [0, 0], sizes = [8, 8], strides = [1, 1]} : vector<8x32xf32> to vector<8x8xf32>
    %cst_51 = arith.constant dense<0.000000e+00> : vector<8x8xf32>
    %115 = tpu.matmul %113, %114, %cst_51 {dimension_numbers = #tpu.dot_dimension_numbers<[1], [0], [0], [1], [0, 0, 1, 1], [], []>} : vector<8x8xf32>, vector<8x8xf32>, vector<8x8xf32> -> vector<8x8xf32>
    %116 = vector.extract_strided_slice %98 {offsets = [0, 8], sizes = [8, 8], strides = [1, 1]} : vector<8x32xf32> to vector<8x8xf32>
    %117 = vector.extract_strided_slice %99 {offsets = [0, 8], sizes = [8, 8], strides = [1, 1]} : vector<8x32xf32> to vector<8x8xf32>
    %cst_52 = arith.constant dense<0.000000e+00> : vector<8x8xf32>
    %118 = tpu.matmul %116, %117, %cst_52 {dimension_numbers = #tpu.dot_dimension_numbers<[1], [1], [0], [0], [0, 0, 1, 0], [], []>} : vector<8x8xf32>, vector<8x8xf32>, vector<8x8xf32> -> vector<8x8xf32>
    %cst_53 = arith.constant dense<0xFF800000> : vector<8xf32>
    %119 = vector.multi_reduction <maximumf>, %118, %cst_53 [1] : vector<8x8xf32> to vector<8xf32>
    %120 = vector.shape_cast %119 : vector<8xf32> to vector<8x1xf32>
    %121 = vector.broadcast %120 : vector<8x1xf32> to vector<8x8xf32>
    %122 = arith.subf %118, %121 : vector<8x8xf32>
    %123 = math.exp %122 : vector<8x8xf32>
    %cst_54 = arith.constant dense<0.000000e+00> : vector<8xf32>
    %124 = vector.multi_reduction <add>, %123, %cst_54 [1] : vector<8x8xf32> to vector<8xf32>
    %125 = vector.shape_cast %124 : vector<8xf32> to vector<8x1xf32>
    %126 = tpu.reciprocal %125 {approx = true} : vector<8x1xf32> -> vector<8x1xf32>
    %127 = vector.broadcast %126 : vector<8x1xf32> to vector<8x8xf32>
    %128 = arith.mulf %123, %127 : vector<8x8xf32>
    %129 = vector.extract_strided_slice %100 {offsets = [0, 8], sizes = [8, 8], strides = [1, 1]} : vector<8x32xf32> to vector<8x8xf32>
    %cst_55 = arith.constant dense<0.000000e+00> : vector<8x8xf32>
    %130 = tpu.matmul %128, %129, %cst_55 {dimension_numbers = #tpu.dot_dimension_numbers<[1], [0], [0], [1], [0, 0, 1, 1], [], []>} : vector<8x8xf32>, vector<8x8xf32>, vector<8x8xf32> -> vector<8x8xf32>
    %131 = vector.extract_strided_slice %98 {offsets = [0, 16], sizes = [8, 8], strides = [1, 1]} : vector<8x32xf32> to vector<8x8xf32>
    %132 = vector.extract_strided_slice %99 {offsets = [0, 16], sizes = [8, 8], strides = [1, 1]} : vector<8x32xf32> to vector<8x8xf32>
    %cst_56 = arith.constant dense<0.000000e+00> : vector<8x8xf32>
    %133 = tpu.matmul %131, %132, %cst_56 {dimension_numbers = #tpu.dot_dimension_numbers<[1], [1], [0], [0], [0, 0, 1, 0], [], []>} : vector<8x8xf32>, vector<8x8xf32>, vector<8x8xf32> -> vector<8x8xf32>
    %cst_57 = arith.constant dense<0xFF800000> : vector<8xf32>
    %134 = vector.multi_reduction <maximumf>, %133, %cst_57 [1] : vector<8x8xf32> to vector<8xf32>
    %135 = vector.shape_cast %134 : vector<8xf32> to vector<8x1xf32>
    %136 = vector.broadcast %135 : vector<8x1xf32> to vector<8x8xf32>
    %137 = arith.subf %133, %136 : vector<8x8xf32>
    %138 = math.exp %137 : vector<8x8xf32>
    %cst_58 = arith.constant dense<0.000000e+00> : vector<8xf32>
    %139 = vector.multi_reduction <add>, %138, %cst_58 [1] : vector<8x8xf32> to vector<8xf32>
    %140 = vector.shape_cast %139 : vector<8xf32> to vector<8x1xf32>
    %141 = tpu.reciprocal %140 {approx = true} : vector<8x1xf32> -> vector<8x1xf32>
    %142 = vector.broadcast %141 : vector<8x1xf32> to vector<8x8xf32>
    %143 = arith.mulf %138, %142 : vector<8x8xf32>
    %144 = vector.extract_strided_slice %100 {offsets = [0, 16], sizes = [8, 8], strides = [1, 1]} : vector<8x32xf32> to vector<8x8xf32>
    %cst_59 = arith.constant dense<0.000000e+00> : vector<8x8xf32>
    %145 = tpu.matmul %143, %144, %cst_59 {dimension_numbers = #tpu.dot_dimension_numbers<[1], [0], [0], [1], [0, 0, 1, 1], [], []>} : vector<8x8xf32>, vector<8x8xf32>, vector<8x8xf32> -> vector<8x8xf32>
    %146 = vector.extract_strided_slice %98 {offsets = [0, 24], sizes = [8, 8], strides = [1, 1]} : vector<8x32xf32> to vector<8x8xf32>
    %147 = vector.extract_strided_slice %99 {offsets = [0, 24], sizes = [8, 8], strides = [1, 1]} : vector<8x32xf32> to vector<8x8xf32>
    %cst_60 = arith.constant dense<0.000000e+00> : vector<8x8xf32>
    %148 = tpu.matmul %146, %147, %cst_60 {dimension_numbers = #tpu.dot_dimension_numbers<[1], [1], [0], [0], [0, 0, 1, 0], [], []>} : vector<8x8xf32>, vector<8x8xf32>, vector<8x8xf32> -> vector<8x8xf32>
    %cst_61 = arith.constant dense<0xFF800000> : vector<8xf32>
    %149 = vector.multi_reduction <maximumf>, %148, %cst_61 [1] : vector<8x8xf32> to vector<8xf32>
    %150 = vector.shape_cast %149 : vector<8xf32> to vector<8x1xf32>
    %151 = vector.broadcast %150 : vector<8x1xf32> to vector<8x8xf32>
    %152 = arith.subf %148, %151 : vector<8x8xf32>
    %153 = math.exp %152 : vector<8x8xf32>
    %cst_62 = arith.constant dense<0.000000e+00> : vector<8xf32>
    %154 = vector.multi_reduction <add>, %153, %cst_62 [1] : vector<8x8xf32> to vector<8xf32>
    %155 = vector.shape_cast %154 : vector<8xf32> to vector<8x1xf32>
    %156 = tpu.reciprocal %155 {approx = true} : vector<8x1xf32> -> vector<8x1xf32>
    %157 = vector.broadcast %156 : vector<8x1xf32> to vector<8x8xf32>
    %158 = arith.mulf %153, %157 : vector<8x8xf32>
    %159 = vector.extract_strided_slice %100 {offsets = [0, 24], sizes = [8, 8], strides = [1, 1]} : vector<8x32xf32> to vector<8x8xf32>
    %cst_63 = arith.constant dense<0.000000e+00> : vector<8x8xf32>
    %160 = tpu.matmul %158, %159, %cst_63 {dimension_numbers = #tpu.dot_dimension_numbers<[1], [0], [0], [1], [0, 0, 1, 1], [], []>} : vector<8x8xf32>, vector<8x8xf32>, vector<8x8xf32> -> vector<8x8xf32>
    %161 = tpu.concatenate %115, %130, %145, %160 in 1 : vector<8x8xf32>, vector<8x8xf32>, vector<8x8xf32>, vector<8x8xf32> -> vector<8x32xf32>
    %162 = tpu.concatenate %97, %161 in 0 : vector<8x32xf32>, vector<8x32xf32> -> vector<16x32xf32>
    %cst_64 = arith.constant dense<0.000000e+00> : vector<16x32xf32>
    %163 = tpu.matmul %162, %10, %cst_64 {dimension_numbers = #tpu.dot_dimension_numbers<[1], [0], [0], [1], [0, 0, 1, 1], [], []>} : vector<16x32xf32>, vector<32x32xf32>, vector<16x32xf32> -> vector<16x32xf32>
    %164 = vector.broadcast %18 : vector<1x32xf32> to vector<16x32xf32>
    %165 = arith.addf %163, %164 : vector<16x32xf32>
    %cst_65 = arith.constant dense<0.000000e+00> : vector<16xf32>
    %166 = vector.multi_reduction <add>, %165, %cst_65 [1] : vector<16x32xf32> to vector<16xf32>
    %167 = vector.shape_cast %166 : vector<16xf32> to vector<16x1xf32>
    %cst_66 = arith.constant 3.200000e+01 : f32
    %168 = vector.broadcast %cst_66 : f32 to vector<16x1xf32>
    %169 = arith.divf %167, %168 : vector<16x1xf32>
    %170 = vector.broadcast %169 : vector<16x1xf32> to vector<16x32xf32>
    %171 = arith.subf %165, %170 : vector<16x32xf32>
    %172 = arith.mulf %171, %171 : vector<16x32xf32>
    %cst_67 = arith.constant dense<0.000000e+00> : vector<16xf32>
    %173 = vector.multi_reduction <add>, %172, %cst_67 [1] : vector<16x32xf32> to vector<16xf32>
    %174 = vector.shape_cast %173 : vector<16xf32> to vector<16x1xf32>
    %cst_68 = arith.constant 3.200000e+01 : f32
    %175 = vector.broadcast %cst_68 : f32 to vector<16x1xf32>
    %176 = arith.divf %174, %175 : vector<16x1xf32>
    %177 = vector.broadcast %169 : vector<16x1xf32> to vector<16x32xf32>
    %178 = arith.subf %165, %177 : vector<16x32xf32>
    %cst_69 = arith.constant 9.99999974E-6 : f32
    %179 = vector.broadcast %cst_69 : f32 to vector<16x1xf32>
    %180 = arith.addf %176, %179 : vector<16x1xf32>
    %181 = math.rsqrt %180 : vector<16x1xf32>
    %182 = vector.broadcast %181 : vector<16x1xf32> to vector<16x32xf32>
    %183 = arith.mulf %178, %182 : vector<16x32xf32>
    %184 = vector.broadcast %20 : vector<1x32xf32> to vector<16x32xf32>
    %185 = arith.mulf %183, %184 : vector<16x32xf32>
    %186 = arith.addf %1, %185 : vector<16x32xf32>
    %187 = vector.broadcast %21 : vector<1x32xf32> to vector<16x32xf32>
    %188 = arith.addf %186, %187 : vector<16x32xf32>
    %cst_70 = arith.constant dense<0.000000e+00> : vector<16x32xf32>
    %189 = tpu.matmul %188, %7, %cst_70 {dimension_numbers = #tpu.dot_dimension_numbers<[1], [0], [0], [1], [0, 0, 1, 1], [], []>} : vector<16x32xf32>, vector<32x32xf32>, vector<16x32xf32> -> vector<16x32xf32>
    %190 = vector.broadcast %15 : vector<1x32xf32> to vector<16x32xf32>
    %191 = arith.addf %189, %190 : vector<16x32xf32>
    %cst_71 = arith.constant dense<0.000000e+00> : vector<32x32xf32>
    %192 = tpu.matmul %3, %8, %cst_71 {dimension_numbers = #tpu.dot_dimension_numbers<[1], [0], [0], [1], [0, 0, 1, 1], [], []>} : vector<32x32xf32>, vector<32x32xf32>, vector<32x32xf32> -> vector<32x32xf32>
    %193 = vector.broadcast %16 : vector<1x32xf32> to vector<32x32xf32>
    %194 = arith.addf %192, %193 : vector<32x32xf32>
    %cst_72 = arith.constant dense<0.000000e+00> : vector<32x32xf32>
    %195 = tpu.matmul %5, %9, %cst_72 {dimension_numbers = #tpu.dot_dimension_numbers<[1], [0], [0], [1], [0, 0, 1, 1], [], []>} : vector<32x32xf32>, vector<32x32xf32>, vector<32x32xf32> -> vector<32x32xf32>
    %196 = vector.broadcast %17 : vector<1x32xf32> to vector<32x32xf32>
    %197 = arith.addf %195, %196 : vector<32x32xf32>
    %198 = vector.extract_strided_slice %191 {offsets = [0, 0], sizes = [8, 32], strides = [1, 1]} : vector<16x32xf32> to vector<8x32xf32>
    %199 = vector.extract_strided_slice %194 {offsets = [0, 0], sizes = [16, 32], strides = [1, 1]} : vector<32x32xf32> to vector<16x32xf32>
    %200 = vector.extract_strided_slice %197 {offsets = [0, 0], sizes = [16, 32], strides = [1, 1]} : vector<32x32xf32> to vector<16x32xf32>
    %201 = vector.extract_strided_slice %198 {offsets = [0, 0], sizes = [8, 8], strides = [1, 1]} : vector<8x32xf32> to vector<8x8xf32>
    %202 = vector.extract_strided_slice %199 {offsets = [0, 0], sizes = [16, 8], strides = [1, 1]} : vector<16x32xf32> to vector<16x8xf32>
    %cst_73 = arith.constant dense<0.000000e+00> : vector<8x16xf32>
    %203 = tpu.matmul %201, %202, %cst_73 {dimension_numbers = #tpu.dot_dimension_numbers<[1], [1], [0], [0], [0, 0, 1, 0], [], []>} : vector<8x8xf32>, vector<16x8xf32>, vector<8x16xf32> -> vector<8x16xf32>
    %cst_74 = arith.constant dense<0xFF800000> : vector<8xf32>
    %204 = vector.multi_reduction <maximumf>, %203, %cst_74 [1] : vector<8x16xf32> to vector<8xf32>
    %205 = vector.shape_cast %204 : vector<8xf32> to vector<8x1xf32>
    %206 = vector.broadcast %205 : vector<8x1xf32> to vector<8x16xf32>
    %207 = arith.subf %203, %206 : vector<8x16xf32>
    %208 = math.exp %207 : vector<8x16xf32>
    %cst_75 = arith.constant dense<0.000000e+00> : vector<8xf32>
    %209 = vector.multi_reduction <add>, %208, %cst_75 [1] : vector<8x16xf32> to vector<8xf32>
    %210 = vector.shape_cast %209 : vector<8xf32> to vector<8x1xf32>
    %211 = tpu.reciprocal %210 {approx = true} : vector<8x1xf32> -> vector<8x1xf32>
    %212 = vector.broadcast %211 : vector<8x1xf32> to vector<8x16xf32>
    %213 = arith.mulf %208, %212 : vector<8x16xf32>
    %214 = vector.extract_strided_slice %200 {offsets = [0, 0], sizes = [16, 8], strides = [1, 1]} : vector<16x32xf32> to vector<16x8xf32>
    %cst_76 = arith.constant dense<0.000000e+00> : vector<8x8xf32>
    %215 = tpu.matmul %213, %214, %cst_76 {dimension_numbers = #tpu.dot_dimension_numbers<[1], [0], [0], [1], [0, 0, 1, 1], [], []>} : vector<8x16xf32>, vector<16x8xf32>, vector<8x8xf32> -> vector<8x8xf32>
    %216 = vector.extract_strided_slice %198 {offsets = [0, 8], sizes = [8, 8], strides = [1, 1]} : vector<8x32xf32> to vector<8x8xf32>
    %217 = vector.extract_strided_slice %199 {offsets = [0, 8], sizes = [16, 8], strides = [1, 1]} : vector<16x32xf32> to vector<16x8xf32>
    %cst_77 = arith.constant dense<0.000000e+00> : vector<8x16xf32>
    %218 = tpu.matmul %216, %217, %cst_77 {dimension_numbers = #tpu.dot_dimension_numbers<[1], [1], [0], [0], [0, 0, 1, 0], [], []>} : vector<8x8xf32>, vector<16x8xf32>, vector<8x16xf32> -> vector<8x16xf32>
    %cst_78 = arith.constant dense<0xFF800000> : vector<8xf32>
    %219 = vector.multi_reduction <maximumf>, %218, %cst_78 [1] : vector<8x16xf32> to vector<8xf32>
    %220 = vector.shape_cast %219 : vector<8xf32> to vector<8x1xf32>
    %221 = vector.broadcast %220 : vector<8x1xf32> to vector<8x16xf32>
    %222 = arith.subf %218, %221 : vector<8x16xf32>
    %223 = math.exp %222 : vector<8x16xf32>
    %cst_79 = arith.constant dense<0.000000e+00> : vector<8xf32>
    %224 = vector.multi_reduction <add>, %223, %cst_79 [1] : vector<8x16xf32> to vector<8xf32>
    %225 = vector.shape_cast %224 : vector<8xf32> to vector<8x1xf32>
    %226 = tpu.reciprocal %225 {approx = true} : vector<8x1xf32> -> vector<8x1xf32>
    %227 = vector.broadcast %226 : vector<8x1xf32> to vector<8x16xf32>
    %228 = arith.mulf %223, %227 : vector<8x16xf32>
    %229 = vector.extract_strided_slice %200 {offsets = [0, 8], sizes = [16, 8], strides = [1, 1]} : vector<16x32xf32> to vector<16x8xf32>
    %cst_80 = arith.constant dense<0.000000e+00> : vector<8x8xf32>
    %230 = tpu.matmul %228, %229, %cst_80 {dimension_numbers = #tpu.dot_dimension_numbers<[1], [0], [0], [1], [0, 0, 1, 1], [], []>} : vector<8x16xf32>, vector<16x8xf32>, vector<8x8xf32> -> vector<8x8xf32>
    %231 = vector.extract_strided_slice %198 {offsets = [0, 16], sizes = [8, 8], strides = [1, 1]} : vector<8x32xf32> to vector<8x8xf32>
    %232 = vector.extract_strided_slice %199 {offsets = [0, 16], sizes = [16, 8], strides = [1, 1]} : vector<16x32xf32> to vector<16x8xf32>
    %cst_81 = arith.constant dense<0.000000e+00> : vector<8x16xf32>
    %233 = tpu.matmul %231, %232, %cst_81 {dimension_numbers = #tpu.dot_dimension_numbers<[1], [1], [0], [0], [0, 0, 1, 0], [], []>} : vector<8x8xf32>, vector<16x8xf32>, vector<8x16xf32> -> vector<8x16xf32>
    %cst_82 = arith.constant dense<0xFF800000> : vector<8xf32>
    %234 = vector.multi_reduction <maximumf>, %233, %cst_82 [1] : vector<8x16xf32> to vector<8xf32>
    %235 = vector.shape_cast %234 : vector<8xf32> to vector<8x1xf32>
    %236 = vector.broadcast %235 : vector<8x1xf32> to vector<8x16xf32>
    %237 = arith.subf %233, %236 : vector<8x16xf32>
    %238 = math.exp %237 : vector<8x16xf32>
    %cst_83 = arith.constant dense<0.000000e+00> : vector<8xf32>
    %239 = vector.multi_reduction <add>, %238, %cst_83 [1] : vector<8x16xf32> to vector<8xf32>
    %240 = vector.shape_cast %239 : vector<8xf32> to vector<8x1xf32>
    %241 = tpu.reciprocal %240 {approx = true} : vector<8x1xf32> -> vector<8x1xf32>
    %242 = vector.broadcast %241 : vector<8x1xf32> to vector<8x16xf32>
    %243 = arith.mulf %238, %242 : vector<8x16xf32>
    %244 = vector.extract_strided_slice %200 {offsets = [0, 16], sizes = [16, 8], strides = [1, 1]} : vector<16x32xf32> to vector<16x8xf32>
    %cst_84 = arith.constant dense<0.000000e+00> : vector<8x8xf32>
    %245 = tpu.matmul %243, %244, %cst_84 {dimension_numbers = #tpu.dot_dimension_numbers<[1], [0], [0], [1], [0, 0, 1, 1], [], []>} : vector<8x16xf32>, vector<16x8xf32>, vector<8x8xf32> -> vector<8x8xf32>
    %246 = vector.extract_strided_slice %198 {offsets = [0, 24], sizes = [8, 8], strides = [1, 1]} : vector<8x32xf32> to vector<8x8xf32>
    %247 = vector.extract_strided_slice %199 {offsets = [0, 24], sizes = [16, 8], strides = [1, 1]} : vector<16x32xf32> to vector<16x8xf32>
    %cst_85 = arith.constant dense<0.000000e+00> : vector<8x16xf32>
    %248 = tpu.matmul %246, %247, %cst_85 {dimension_numbers = #tpu.dot_dimension_numbers<[1], [1], [0], [0], [0, 0, 1, 0], [], []>} : vector<8x8xf32>, vector<16x8xf32>, vector<8x16xf32> -> vector<8x16xf32>
    %cst_86 = arith.constant dense<0xFF800000> : vector<8xf32>
    %249 = vector.multi_reduction <maximumf>, %248, %cst_86 [1] : vector<8x16xf32> to vector<8xf32>
    %250 = vector.shape_cast %249 : vector<8xf32> to vector<8x1xf32>
    %251 = vector.broadcast %250 : vector<8x1xf32> to vector<8x16xf32>
    %252 = arith.subf %248, %251 : vector<8x16xf32>
    %253 = math.exp %252 : vector<8x16xf32>
    %cst_87 = arith.constant dense<0.000000e+00> : vector<8xf32>
    %254 = vector.multi_reduction <add>, %253, %cst_87 [1] : vector<8x16xf32> to vector<8xf32>
    %255 = vector.shape_cast %254 : vector<8xf32> to vector<8x1xf32>
    %256 = tpu.reciprocal %255 {approx = true} : vector<8x1xf32> -> vector<8x1xf32>
    %257 = vector.broadcast %256 : vector<8x1xf32> to vector<8x16xf32>
    %258 = arith.mulf %253, %257 : vector<8x16xf32>
    %259 = vector.extract_strided_slice %200 {offsets = [0, 24], sizes = [16, 8], strides = [1, 1]} : vector<16x32xf32> to vector<16x8xf32>
    %cst_88 = arith.constant dense<0.000000e+00> : vector<8x8xf32>
    %260 = tpu.matmul %258, %259, %cst_88 {dimension_numbers = #tpu.dot_dimension_numbers<[1], [0], [0], [1], [0, 0, 1, 1], [], []>} : vector<8x16xf32>, vector<16x8xf32>, vector<8x8xf32> -> vector<8x8xf32>
    %261 = tpu.concatenate %215, %230, %245, %260 in 1 : vector<8x8xf32>, vector<8x8xf32>, vector<8x8xf32>, vector<8x8xf32> -> vector<8x32xf32>
    %262 = vector.extract_strided_slice %191 {offsets = [8, 0], sizes = [8, 32], strides = [1, 1]} : vector<16x32xf32> to vector<8x32xf32>
    %263 = vector.extract_strided_slice %194 {offsets = [16, 0], sizes = [16, 32], strides = [1, 1]} : vector<32x32xf32> to vector<16x32xf32>
    %264 = vector.extract_strided_slice %197 {offsets = [16, 0], sizes = [16, 32], strides = [1, 1]} : vector<32x32xf32> to vector<16x32xf32>
    %265 = vector.extract_strided_slice %262 {offsets = [0, 0], sizes = [8, 8], strides = [1, 1]} : vector<8x32xf32> to vector<8x8xf32>
    %266 = vector.extract_strided_slice %263 {offsets = [0, 0], sizes = [16, 8], strides = [1, 1]} : vector<16x32xf32> to vector<16x8xf32>
    %cst_89 = arith.constant dense<0.000000e+00> : vector<8x16xf32>
    %267 = tpu.matmul %265, %266, %cst_89 {dimension_numbers = #tpu.dot_dimension_numbers<[1], [1], [0], [0], [0, 0, 1, 0], [], []>} : vector<8x8xf32>, vector<16x8xf32>, vector<8x16xf32> -> vector<8x16xf32>
    %cst_90 = arith.constant dense<0xFF800000> : vector<8xf32>
    %268 = vector.multi_reduction <maximumf>, %267, %cst_90 [1] : vector<8x16xf32> to vector<8xf32>
    %269 = vector.shape_cast %268 : vector<8xf32> to vector<8x1xf32>
    %270 = vector.broadcast %269 : vector<8x1xf32> to vector<8x16xf32>
    %271 = arith.subf %267, %270 : vector<8x16xf32>
    %272 = math.exp %271 : vector<8x16xf32>
    %cst_91 = arith.constant dense<0.000000e+00> : vector<8xf32>
    %273 = vector.multi_reduction <add>, %272, %cst_91 [1] : vector<8x16xf32> to vector<8xf32>
    %274 = vector.shape_cast %273 : vector<8xf32> to vector<8x1xf32>
    %275 = tpu.reciprocal %274 {approx = true} : vector<8x1xf32> -> vector<8x1xf32>
    %276 = vector.broadcast %275 : vector<8x1xf32> to vector<8x16xf32>
    %277 = arith.mulf %272, %276 : vector<8x16xf32>
    %278 = vector.extract_strided_slice %264 {offsets = [0, 0], sizes = [16, 8], strides = [1, 1]} : vector<16x32xf32> to vector<16x8xf32>
    %cst_92 = arith.constant dense<0.000000e+00> : vector<8x8xf32>
    %279 = tpu.matmul %277, %278, %cst_92 {dimension_numbers = #tpu.dot_dimension_numbers<[1], [0], [0], [1], [0, 0, 1, 1], [], []>} : vector<8x16xf32>, vector<16x8xf32>, vector<8x8xf32> -> vector<8x8xf32>
    %280 = vector.extract_strided_slice %262 {offsets = [0, 8], sizes = [8, 8], strides = [1, 1]} : vector<8x32xf32> to vector<8x8xf32>
    %281 = vector.extract_strided_slice %263 {offsets = [0, 8], sizes = [16, 8], strides = [1, 1]} : vector<16x32xf32> to vector<16x8xf32>
    %cst_93 = arith.constant dense<0.000000e+00> : vector<8x16xf32>
    %282 = tpu.matmul %280, %281, %cst_93 {dimension_numbers = #tpu.dot_dimension_numbers<[1], [1], [0], [0], [0, 0, 1, 0], [], []>} : vector<8x8xf32>, vector<16x8xf32>, vector<8x16xf32> -> vector<8x16xf32>
    %cst_94 = arith.constant dense<0xFF800000> : vector<8xf32>
    %283 = vector.multi_reduction <maximumf>, %282, %cst_94 [1] : vector<8x16xf32> to vector<8xf32>
    %284 = vector.shape_cast %283 : vector<8xf32> to vector<8x1xf32>
    %285 = vector.broadcast %284 : vector<8x1xf32> to vector<8x16xf32>
    %286 = arith.subf %282, %285 : vector<8x16xf32>
    %287 = math.exp %286 : vector<8x16xf32>
    %cst_95 = arith.constant dense<0.000000e+00> : vector<8xf32>
    %288 = vector.multi_reduction <add>, %287, %cst_95 [1] : vector<8x16xf32> to vector<8xf32>
    %289 = vector.shape_cast %288 : vector<8xf32> to vector<8x1xf32>
    %290 = tpu.reciprocal %289 {approx = true} : vector<8x1xf32> -> vector<8x1xf32>
    %291 = vector.broadcast %290 : vector<8x1xf32> to vector<8x16xf32>
    %292 = arith.mulf %287, %291 : vector<8x16xf32>
    %293 = vector.extract_strided_slice %264 {offsets = [0, 8], sizes = [16, 8], strides = [1, 1]} : vector<16x32xf32> to vector<16x8xf32>
    %cst_96 = arith.constant dense<0.000000e+00> : vector<8x8xf32>
    %294 = tpu.matmul %292, %293, %cst_96 {dimension_numbers = #tpu.dot_dimension_numbers<[1], [0], [0], [1], [0, 0, 1, 1], [], []>} : vector<8x16xf32>, vector<16x8xf32>, vector<8x8xf32> -> vector<8x8xf32>
    %295 = vector.extract_strided_slice %262 {offsets = [0, 16], sizes = [8, 8], strides = [1, 1]} : vector<8x32xf32> to vector<8x8xf32>
    %296 = vector.extract_strided_slice %263 {offsets = [0, 16], sizes = [16, 8], strides = [1, 1]} : vector<16x32xf32> to vector<16x8xf32>
    %cst_97 = arith.constant dense<0.000000e+00> : vector<8x16xf32>
    %297 = tpu.matmul %295, %296, %cst_97 {dimension_numbers = #tpu.dot_dimension_numbers<[1], [1], [0], [0], [0, 0, 1, 0], [], []>} : vector<8x8xf32>, vector<16x8xf32>, vector<8x16xf32> -> vector<8x16xf32>
    %cst_98 = arith.constant dense<0xFF800000> : vector<8xf32>
    %298 = vector.multi_reduction <maximumf>, %297, %cst_98 [1] : vector<8x16xf32> to vector<8xf32>
    %299 = vector.shape_cast %298 : vector<8xf32> to vector<8x1xf32>
    %300 = vector.broadcast %299 : vector<8x1xf32> to vector<8x16xf32>
    %301 = arith.subf %297, %300 : vector<8x16xf32>
    %302 = math.exp %301 : vector<8x16xf32>
    %cst_99 = arith.constant dense<0.000000e+00> : vector<8xf32>
    %303 = vector.multi_reduction <add>, %302, %cst_99 [1] : vector<8x16xf32> to vector<8xf32>
    %304 = vector.shape_cast %303 : vector<8xf32> to vector<8x1xf32>
    %305 = tpu.reciprocal %304 {approx = true} : vector<8x1xf32> -> vector<8x1xf32>
    %306 = vector.broadcast %305 : vector<8x1xf32> to vector<8x16xf32>
    %307 = arith.mulf %302, %306 : vector<8x16xf32>
    %308 = vector.extract_strided_slice %264 {offsets = [0, 16], sizes = [16, 8], strides = [1, 1]} : vector<16x32xf32> to vector<16x8xf32>
    %cst_100 = arith.constant dense<0.000000e+00> : vector<8x8xf32>
    %309 = tpu.matmul %307, %308, %cst_100 {dimension_numbers = #tpu.dot_dimension_numbers<[1], [0], [0], [1], [0, 0, 1, 1], [], []>} : vector<8x16xf32>, vector<16x8xf32>, vector<8x8xf32> -> vector<8x8xf32>
    %310 = vector.extract_strided_slice %262 {offsets = [0, 24], sizes = [8, 8], strides = [1, 1]} : vector<8x32xf32> to vector<8x8xf32>
    %311 = vector.extract_strided_slice %263 {offsets = [0, 24], sizes = [16, 8], strides = [1, 1]} : vector<16x32xf32> to vector<16x8xf32>
    %cst_101 = arith.constant dense<0.000000e+00> : vector<8x16xf32>
    %312 = tpu.matmul %310, %311, %cst_101 {dimension_numbers = #tpu.dot_dimension_numbers<[1], [1], [0], [0], [0, 0, 1, 0], [], []>} : vector<8x8xf32>, vector<16x8xf32>, vector<8x16xf32> -> vector<8x16xf32>
    %cst_102 = arith.constant dense<0xFF800000> : vector<8xf32>
    %313 = vector.multi_reduction <maximumf>, %312, %cst_102 [1] : vector<8x16xf32> to vector<8xf32>
    %314 = vector.shape_cast %313 : vector<8xf32> to vector<8x1xf32>
    %315 = vector.broadcast %314 : vector<8x1xf32> to vector<8x16xf32>
    %316 = arith.subf %312, %315 : vector<8x16xf32>
    %317 = math.exp %316 : vector<8x16xf32>
    %cst_103 = arith.constant dense<0.000000e+00> : vector<8xf32>
    %318 = vector.multi_reduction <add>, %317, %cst_103 [1] : vector<8x16xf32> to vector<8xf32>
    %319 = vector.shape_cast %318 : vector<8xf32> to vector<8x1xf32>
    %320 = tpu.reciprocal %319 {approx = true} : vector<8x1xf32> -> vector<8x1xf32>
    %321 = vector.broadcast %320 : vector<8x1xf32> to vector<8x16xf32>
    %322 = arith.mulf %317, %321 : vector<8x16xf32>
    %323 = vector.extract_strided_slice %264 {offsets = [0, 24], sizes = [16, 8], strides = [1, 1]} : vector<16x32xf32> to vector<16x8xf32>
    %cst_104 = arith.constant dense<0.000000e+00> : vector<8x8xf32>
    %324 = tpu.matmul %322, %323, %cst_104 {dimension_numbers = #tpu.dot_dimension_numbers<[1], [0], [0], [1], [0, 0, 1, 1], [], []>} : vector<8x16xf32>, vector<16x8xf32>, vector<8x8xf32> -> vector<8x8xf32>
    %325 = tpu.concatenate %279, %294, %309, %324 in 1 : vector<8x8xf32>, vector<8x8xf32>, vector<8x8xf32>, vector<8x8xf32> -> vector<8x32xf32>
    %326 = tpu.concatenate %261, %325 in 0 : vector<8x32xf32>, vector<8x32xf32> -> vector<16x32xf32>
    %cst_105 = arith.constant dense<0.000000e+00> : vector<16x32xf32>
    %327 = tpu.matmul %326, %11, %cst_105 {dimension_numbers = #tpu.dot_dimension_numbers<[1], [0], [0], [1], [0, 0, 1, 1], [], []>} : vector<16x32xf32>, vector<32x32xf32>, vector<16x32xf32> -> vector<16x32xf32>
    %328 = vector.broadcast %19 : vector<1x32xf32> to vector<16x32xf32>
    %329 = arith.addf %327, %328 : vector<16x32xf32>
    %cst_106 = arith.constant dense<0.000000e+00> : vector<16xf32>
    %330 = vector.multi_reduction <add>, %329, %cst_106 [1] : vector<16x32xf32> to vector<16xf32>
    %331 = vector.shape_cast %330 : vector<16xf32> to vector<16x1xf32>
    %cst_107 = arith.constant 3.200000e+01 : f32
    %332 = vector.broadcast %cst_107 : f32 to vector<16x1xf32>
    %333 = arith.divf %331, %332 : vector<16x1xf32>
    %334 = vector.broadcast %333 : vector<16x1xf32> to vector<16x32xf32>
    %335 = arith.subf %329, %334 : vector<16x32xf32>
    %336 = arith.mulf %335, %335 : vector<16x32xf32>
    %cst_108 = arith.constant dense<0.000000e+00> : vector<16xf32>
    %337 = vector.multi_reduction <add>, %336, %cst_108 [1] : vector<16x32xf32> to vector<16xf32>
    %338 = vector.shape_cast %337 : vector<16xf32> to vector<16x1xf32>
    %cst_109 = arith.constant 3.200000e+01 : f32
    %339 = vector.broadcast %cst_109 : f32 to vector<16x1xf32>
    %340 = arith.divf %338, %339 : vector<16x1xf32>
    %341 = vector.broadcast %333 : vector<16x1xf32> to vector<16x32xf32>
    %342 = arith.subf %329, %341 : vector<16x32xf32>
    %cst_110 = arith.constant 9.99999974E-6 : f32
    %343 = vector.broadcast %cst_110 : f32 to vector<16x1xf32>
    %344 = arith.addf %340, %343 : vector<16x1xf32>
    %345 = math.rsqrt %344 : vector<16x1xf32>
    %346 = vector.broadcast %345 : vector<16x1xf32> to vector<16x32xf32>
    %347 = arith.mulf %342, %346 : vector<16x32xf32>
    %348 = vector.broadcast %22 : vector<1x32xf32> to vector<16x32xf32>
    %349 = arith.mulf %347, %348 : vector<16x32xf32>
    %350 = arith.addf %188, %349 : vector<16x32xf32>
    %351 = vector.broadcast %23 : vector<1x32xf32> to vector<16x32xf32>
    %352 = arith.addf %350, %351 : vector<16x32xf32>
    %cst_111 = arith.constant dense<0.000000e+00> : vector<16x64xf32>
    %353 = tpu.matmul %352, %12, %cst_111 {dimension_numbers = #tpu.dot_dimension_numbers<[1], [0], [0], [1], [0, 0, 1, 1], [], []>} : vector<16x32xf32>, vector<32x64xf32>, vector<16x64xf32> -> vector<16x64xf32>
    %354 = vector.broadcast %26 : vector<1x64xf32> to vector<16x64xf32>
    %355 = arith.addf %353, %354 : vector<16x64xf32>
    %cst_112 = arith.constant 0.000000e+00 : f32
    %356 = vector.broadcast %cst_112 : f32 to vector<16x64xf32>
    %357 = arith.maximumf %355, %356 : vector<16x64xf32>
    %cst_113 = arith.constant dense<0.000000e+00> : vector<16x32xf32>
    %358 = tpu.matmul %357, %13, %cst_113 {dimension_numbers = #tpu.dot_dimension_numbers<[1], [0], [0], [1], [0, 0, 1, 1], [], []>} : vector<16x64xf32>, vector<64x32xf32>, vector<16x32xf32> -> vector<16x32xf32>
    %359 = vector.broadcast %27 : vector<1x32xf32> to vector<16x32xf32>
    %360 = arith.addf %358, %359 : vector<16x32xf32>
    %cst_114 = arith.constant dense<0.000000e+00> : vector<16xf32>
    %361 = vector.multi_reduction <add>, %360, %cst_114 [1] : vector<16x32xf32> to vector<16xf32>
    %362 = vector.shape_cast %361 : vector<16xf32> to vector<16x1xf32>
    %cst_115 = arith.constant 3.200000e+01 : f32
    %363 = vector.broadcast %cst_115 : f32 to vector<16x1xf32>
    %364 = arith.divf %362, %363 : vector<16x1xf32>
    %365 = vector.broadcast %364 : vector<16x1xf32> to vector<16x32xf32>
    %366 = arith.subf %360, %365 : vector<16x32xf32>
    %367 = arith.mulf %366, %366 : vector<16x32xf32>
    %cst_116 = arith.constant dense<0.000000e+00> : vector<16xf32>
    %368 = vector.multi_reduction <add>, %367, %cst_116 [1] : vector<16x32xf32> to vector<16xf32>
    %369 = vector.shape_cast %368 : vector<16xf32> to vector<16x1xf32>
    %cst_117 = arith.constant 3.200000e+01 : f32
    %370 = vector.broadcast %cst_117 : f32 to vector<16x1xf32>
    %371 = arith.divf %369, %370 : vector<16x1xf32>
    %372 = vector.broadcast %364 : vector<16x1xf32> to vector<16x32xf32>
    %373 = arith.subf %360, %372 : vector<16x32xf32>
    %cst_118 = arith.constant 9.99999974E-6 : f32
    %374 = vector.broadcast %cst_118 : f32 to vector<16x1xf32>
    %375 = arith.addf %371, %374 : vector<16x1xf32>
    %376 = math.rsqrt %375 : vector<16x1xf32>
    %377 = vector.broadcast %376 : vector<16x1xf32> to vector<16x32xf32>
    %378 = arith.mulf %373, %377 : vector<16x32xf32>
    %379 = vector.broadcast %24 : vector<1x32xf32> to vector<16x32xf32>
    %380 = arith.mulf %378, %379 : vector<16x32xf32>
    %381 = arith.addf %352, %380 : vector<16x32xf32>
    %382 = vector.broadcast %25 : vector<1x32xf32> to vector<16x32xf32>
    %383 = arith.addf %381, %382 : vector<16x32xf32>
    %384 = vector.shape_cast %383 : vector<16x32xf32> to vector<2x8x32xf32>
    %c0_119 = arith.constant 0 : index
    %c0_120 = arith.constant 0 : index
    %c0_121 = arith.constant 0 : index
    %385 = vector.load %arg6[%c0_119, %c0_120, %c0_121] : memref<2x8x32xf32, #tpu.memory_space<vmem>>, vector<2x8x32xf32>
    tpu.vector_store %arg6[%c0_119, %c0_120, %c0_121], %384 {strides = array<i32>} : memref<2x8x32xf32, #tpu.memory_space<vmem>>, vector<2x8x32xf32>,
    return
  }
  func.func @transform_0(%arg0: i32) -> (i32, i32, i32) {
    %c0_i32 = arith.constant 0 : i32
    %c0_i32_0 = arith.constant 0 : i32
    %c0_i32_1 = arith.constant 0 : i32
    return %arg0, %c0_i32, %c0_i32_0 : i32, i32, i32
  }
  func.func @transform_1(%arg0: i32) -> (i32, i32, i32) {
    %c0_i32 = arith.constant 0 : i32
    %c0_i32_0 = arith.constant 0 : i32
    %c0_i32_1 = arith.constant 0 : i32
    return %arg0, %c0_i32, %c0_i32_0 : i32, i32, i32
  }
  func.func @transform_2(%arg0: i32) -> (i32, i32, i32) {
    %c0_i32 = arith.constant 0 : i32
    %c0_i32_0 = arith.constant 0 : i32
    %c0_i32_1 = arith.constant 0 : i32
    return %arg0, %c0_i32, %c0_i32_0 : i32, i32, i32
  }
  func.func @transform_3(%arg0: i32) -> (i32, i32) {
    %c0_i32 = arith.constant 0 : i32
    %c0_i32_0 = arith.constant 0 : i32
    %c0_i32_1 = arith.constant 0 : i32
    return %c0_i32, %c0_i32_0 : i32, i32
  }
  func.func @transform_4(%arg0: i32) -> (i32, i32) {
    %c0_i32 = arith.constant 0 : i32
    %c0_i32_0 = arith.constant 0 : i32
    %c0_i32_1 = arith.constant 0 : i32
    return %c0_i32, %c0_i32_0 : i32, i32
  }
  func.func @transform_5(%arg0: i32) -> (i32, i32, i32) {
    %c0_i32 = arith.constant 0 : i32
    %c0_i32_0 = arith.constant 0 : i32
    %c0_i32_1 = arith.constant 0 : i32
    return %arg0, %c0_i32, %c0_i32_0 : i32, i32, i32
  }
}

</mosaic_0001>

<bundles_post_ra>
// kernel: tpu_custom_call.1
= control target key start
LH: loop header
LB: loop body
LE: loop exit
PB: predicated region body
PF: predicated region fallthrough
CT: control target
= control target key end

     0   :  { %10 = vsyncpa [#allocation3], 0  ;;  %s5256_s0 = inlined_call_operand.hbm [shape: f32[2,8,32], index: 0, kind: input, shape index: {}]   ;;  %s5257_s1 = inlined_call_operand.hbm [shape: f32[2,16,32], index: 1, kind: input, shape index: {}]   ;;  %s5258_s2 = inlined_call_operand.hbm [shape: f32[2,16,32], index: 2, kind: input, shape index: {}]   ;;  %s5259_s3 = inlined_call_operand.hbm [shape: f32[64,1024], index: 3, kind: input, shape index: {}]   ;;  %s5260_s4 = inlined_call_operand.hbm [shape: f32[16,128], index: 4, kind: input, shape index: {}]   ;;  %s5261_s5 = inlined_call_operand.hbm [shape: f32[2,8,32], index: 5, kind: output, shape index: {}]  }
   0x1   :  { %11 = vsyncpa [#allocation6], 0 }
   0x2   :  { %12 = vsyncpa [#allocation9], 0 }
   0x3   :  { %13 = vsyncpa [#allocation4], 0  ;;  %s4699_s18 = smov [#allocation5]   ;;  %s4700_s20 = smov [#allocation8]  }
   0x4   :  { %s31_s19 = sshll.u32 %s4699_s18, 4  ;;  %s55_s21 = sshll.u32 %s4700_s20, 4  ;;  %s32_s19 = int_to_ptr.vmem [resolvable:$true] %s31_s19  ;;  %s4754_s21 = int_to_ptr.vmem [resolvable:$true] %s55_s21 }
   0x5   :  { %s4559_s24 = scalar_lea.hbm %s5257_s1, 512 }
   0x6   :  { %p4560_p0 = scmp.ne.s32.totalorder %s5257_s1, %s4559_s24  ;;  %p4563_p1 = scmp.lt.u32.totalorder %s4559_s24, %s5257_s1 }
   0x8   :  { %p4565_p2 = pnand %p4563_p1, %p4560_p0 }
   0xa   :  { %4568 = shalt.err (!%p4565_p2)
}
   0xb   :  { %s4569_s29 = scalar_lea.vmem %s32_s19, 512  ;;  %p4574_p4 = scmp.lt.s32.totalorder %s32_s19, %s32_s19 }
   0xc   :  { %p4570_p3 = scmp.ne.s32.totalorder %s32_s19, %s4569_s29  ;;  %p4575_p5 = scmp.lt.s32.totalorder %s4569_s29, %s4569_s29 }
   0xe   :  { %p4576_p6 = por %p4575_p5, %p4574_p4 }
  0x10   :  { %p4577_p7 = pnand %p4576_p6, %p4570_p3 }
  0x12   :  { %4580 = shalt.err (!%p4577_p7)
}
  0x13   :  { %s4701_s30 = smov 128   ;;  %s4702_s6 = smov 8  }
  0x14   :  { %37 = dma.hbm_to_vmem [thread:$0]  %s5257_s1, 512, %s32_s19, [#allocation6], %s4701_s30, %s4701_s30, %s4702_s6  }
  0x15   :  { %s4581_s11 = scalar_lea.hbm %s5259_s3, 8192 }
  0x16   :  { %p4582_p8 = scmp.ne.s32.totalorder %s5259_s3, %s4581_s11  ;;  %p4585_p9 = scmp.lt.u32.totalorder %s4581_s11, %s5259_s3 }
  0x18   :  { %p4587_p10 = pnand %p4585_p9, %p4582_p8 }
  0x1a   :  { %4590 = shalt.err (!%p4587_p10)
}
  0x1b   :  { %s4591_s16 = scalar_lea.vmem %s4754_s21, 8192  ;;  %p4596_p12 = scmp.lt.s32.totalorder %s4754_s21, %s4754_s21 }
  0x1c   :  { %p4592_p11 = scmp.ne.s32.totalorder %s4754_s21, %s4591_s16  ;;  %p4597_p13 = scmp.lt.s32.totalorder %s4591_s16, %s4591_s16 }
  0x1e   :  { %p4598_p0 = por %p4597_p13, %p4596_p12 }
  0x20   :  { %p4599_p1 = pnand %p4598_p0, %p4592_p11 }
  0x22   :  { %4602 = shalt.err (!%p4599_p1)
}
  0x23   :  { %s4703_s1 = smov 1024   ;;  %s4704_s17 = smov 64  }
  0x24   :  { %61 = dma.hbm_to_vmem [thread:$0]  %s5259_s3, 8192, %s4754_s21, [#allocation9], %s4703_s1, %s4703_s1, %s4704_s17  }
  0x25   :  { %s4705_s20 = smov [#allocation2]   ;;  %s4706_s23 = smov [#allocation7]  }
  0x26   :  { %s19_s22 = sshll.u32 %s4705_s20, 4  ;;  %s43_s24 = sshll.u32 %s4706_s23, 4  ;;  %s20_s22 = int_to_ptr.vmem [resolvable:$true] %s19_s22  ;;  %s4789_s24 = int_to_ptr.vmem [resolvable:$true] %s43_s24 }
  0x27   :  { %s4603_s27 = scalar_lea.hbm %s5256_s0, 256 }
  0x28   :  { %p4604_p2 = scmp.ne.s32.totalorder %s5256_s0, %s4603_s27  ;;  %p4607_p3 = scmp.lt.u32.totalorder %s4603_s27, %s5256_s0 }
  0x2a   :  { %p4609_p4 = pnand %p4607_p3, %p4604_p2 }
  0x2c   :  { %4612 = shalt.err (!%p4609_p4)
}
  0x2d   :  { %s4613_s3 = scalar_lea.vmem %s20_s22, 256  ;;  %p4618_p6 = scmp.lt.s32.totalorder %s20_s22, %s20_s22 }
  0x2e   :  { %p4614_p5 = scmp.ne.s32.totalorder %s20_s22, %s4613_s3  ;;  %p4619_p7 = scmp.lt.s32.totalorder %s4613_s3, %s4613_s3 }
  0x30   :  { %p4620_p8 = por %p4619_p7, %p4618_p6 }
  0x32   :  { %p4621_p9 = pnand %p4620_p8, %p4614_p5 }
  0x34   :  { %4624 = shalt.err (!%p4621_p9)
}
  0x35   :  { %25 = dma.hbm_to_vmem [thread:$0]  %s5256_s0, 256, %s20_s22, [#allocation3], %s4701_s30, %s4701_s30, %s4702_s6  }
  0x36   :  { %s4625_s12 = scalar_lea.hbm %s5258_s2, 512 }
  0x37   :  { %p4626_p10 = scmp.ne.s32.totalorder %s5258_s2, %s4625_s12  ;;  %p4629_p11 = scmp.lt.u32.totalorder %s4625_s12, %s5258_s2 }
  0x39   :  { %p4631_p12 = pnand %p4629_p11, %p4626_p10 }
  0x3b   :  { %4634 = shalt.err (!%p4631_p12)
}
  0x3c   :  { %s4635_s1 = scalar_lea.vmem %s4789_s24, 512  ;;  %p4640_p0 = scmp.lt.s32.totalorder %s4789_s24, %s4789_s24 }
  0x3d   :  { %p4636_p13 = scmp.ne.s32.totalorder %s4789_s24, %s4635_s1  ;;  %p4641_p1 = scmp.lt.s32.totalorder %s4635_s1, %s4635_s1 }
  0x3f   :  { %p4642_p2 = por %p4641_p1, %p4640_p0 }
  0x41   :  { %p4643_p3 = pnand %p4642_p2, %p4636_p13 }
  0x43   :  { %4646 = shalt.err (!%p4643_p3)
}
  0x44   :  { %49 = dma.hbm_to_vmem [thread:$0]  %s5258_s2, 512, %s4789_s24, [#allocation6], %s4701_s30, %s4701_s30, %s4702_s6  }
  0x45   :  { %s4707_s19 = smov [#allocation10]   ;;  %s4647_s25 = scalar_lea.hbm %s5260_s4, 256 }
  0x46   :  { %s67_s20 = sshll.u32 %s4707_s19, 4  ;;  %p4648_p4 = scmp.ne.s32.totalorder %s5260_s4, %s4647_s25  ;;  %s68_s20 = int_to_ptr.vmem [resolvable:$true] %s67_s20 }
  0x47   :  { %p4651_p5 = scmp.lt.u32.totalorder %s4647_s25, %s5260_s4 }
  0x49   :  { %p4653_p6 = pnand %p4651_p5, %p4648_p4 }
  0x4b   :  { %4656 = shalt.err (!%p4653_p6)
}
  0x4c   :  { %s4657_s7 = scalar_lea.vmem %s68_s20, 256  ;;  %p4662_p8 = scmp.lt.s32.totalorder %s68_s20, %s68_s20 }
  0x4d   :  { %p4658_p7 = scmp.ne.s32.totalorder %s68_s20, %s4657_s7  ;;  %p4663_p9 = scmp.lt.s32.totalorder %s4657_s7, %s4657_s7 }
  0x4f   :  { %p4664_p10 = por %p4663_p9, %p4662_p8 }
  0x51   :  { %p4665_p11 = pnand %p4664_p10, %p4658_p7 }
  0x53   :  { %4668 = shalt.err (!%p4665_p11)
}
  0x54   :  { %73 = dma.hbm_to_vmem [thread:$0]  %s5260_s4, 256, %s68_s20, [#allocation9], %s4701_s30, %s4701_s30, %s4702_s6  }
  0x55   :  { %4691 = dma.done.wait [#allocation3], 256  }
  0x56   :  { %4692 = vsyncadd [#allocation3], 4294967040 }
  0x57   :  { %4693 = dma.done.wait [#allocation6], 1024  }
  0x58   :  { %4694 = vsyncadd [#allocation6], 4294966272 }
  0x59   :  { %4695 = dma.done.wait [#allocation9], 8448  }
  0x5a   :  { %4696 = vsyncadd [#allocation9], 4294958848  ;;  %vm153_vm0 = vcmask 261120   ;;  %v99_v0 = vld [vmem:[#allocation8] sm:$0xff]  ;;  %v4841_v5 = vld [vmem:[#allocation2] sm:$0xff]  ;;  %v4708_v8 = vmov 0.0  }
  0x5b   :  { %v100_v1 = vld [vmem:[#allocation8 + $0x40] sm:$0xff]  ;;  %3984 = vmatprep.mubr.msk.f32.mxu0 %vm153_vm0, %v4841_v5  ;;  %v4845_v7 = vld [vmem:[#allocation2 + $0x8] sm:$0xff]  ;;  %3992 = vmatprep.subr.mxu1 %v4708_v8  ;;  %vm4709_vm1 = vmmov 0   ;;  %s4710_s4 = smov 120   ;;  %s4711_s8 = smov 96   ;;  %vm238_vm2 = vcmask 64512  }
  0x5c   :  { %v101_v2 = vld [vmem:[#allocation8 + $0x80] sm:$0xff]  ;;  %v4270_v3 = vpack.c.bf16 %v100_v1, %v99_v0  ;;  %3994 = vmatprep.mubr.msk.f32.mxu1 %vm4709_vm1, %v4708_v8  ;;  %s4712_s3 = smov 80   ;;  %s4713_s21 = smov 88   ;;  %vm908_vm3 = vcmask 130048   ;;  %vm910_vm4 = vcmask 195584   ;;  %vm5036_vm5 = vmpackc.low %vm238_vm2, %vm238_vm2  ;;  %vm3607_vm6 = vcmask 523264  }
  0x5d   :  { %v102_v4 = vld [vmem:[#allocation8 + $0xc0] sm:$0xff]  ;;  %s4714_s9 = smov 72   ;;  %s4715_s10 = smov 112  }
  0x5e   :  { %v4274_v6 = vpack.c.bf16 %v102_v4, %v101_v2  ;;  %4271 = vmatprep.subr.bf16.mxu0 %v4270_v3  ;;  %v3750_v9 = vld [vmem:[#allocation10] ss:$0 sm:$0xff]  ;;  %s4716_s11 = smov 104   ;;  %s4717_s12 = smov 56  }
  0x5f   :  { %4273 = vmatpush3.bf16.msra.mxu0 %v4270_v3  ;;  %s4718_s13 = smov 40   ;;  %s4719_s14 = smov 48  }
  0x60   :  { %4275 = vmatprep.subr.bf16.mxu0 %v4274_v6  ;;  %s4721_s15 = smov 24   ;;  %s4723_s16 = smov [#allocation11]  }
  0x61   :  { %s3736_s1 = sshll.u32 %s4723_s16, 4  ;;  %s3737_s1 = int_to_ptr.vmem [resolvable:$true] %s3736_s1 }
  0x62   :  { %s4669_s0 = scalar_lea.vmem %s3737_s1, 256  ;;  %p4674_p13 = scmp.lt.s32.totalorder %s3737_s1, %s3737_s1 }
  0x63   :  { %4277 = vmatpush3.bf16.msra.mxu0 %v4274_v6  ;;  %p4670_p12 = scmp.ne.s32.totalorder %s3737_s1, %s4669_s0  ;;  %p4675_p0 = scmp.lt.s32.totalorder %s4669_s0, %s4669_s0 }
  0x64   :  { %3987 = vmatprep.subr.mxu0 %v4708_v8 }
  0x65   :  { %p4676_p1 = por %p4675_p0, %p4674_p13 }
  0x66   :  { %3985 = vmatmul.mubr.msk.f32.vlgmr.msra.gmra.mrb[0].mxu0 %vm153_vm0, %v4845_v7 }
  0x67   :  { %3989 = vmatprep.mubr.msk.f32.mxu0 %vm4709_vm1, %v4708_v8  ;;  %p4677_p2 = pnand %p4676_p1, %p4670_p12 }
 0x139   :  { %v3986_v10 = vpop.f32.mrb[0].mxu0 }
 0x13a   :  { %v226_v11 = vpop.f32.mrb[1].mxu0  ;;  %v4865_v13 = vadd.f32 %v3986_v10, %v3750_v9 }
 0x13b   :  { %v4855_v12 = vadd.f32 %v3750_v9, %v226_v11 }
 0x13d   :  { %400 = vrot.lane.b32.xlu1 %v4855_v12, %s4710_s4  ;;  %236 = vrot.lane.b32.xlu0 %v4855_v12, %s4711_s8 }
 0x141   :  { %567 = vrot.lane.b32.xlu1 %v4855_v12, %s4712_s3  ;;  %402 = vrot.lane.b32.xlu0 %v4855_v12, %s4713_s21 }
 0x145   :  { %732 = vrot.lane.b32.xlu1 %v4855_v12, %s4714_s9  ;;  %565 = vrot.lane.b32.xlu0 %v4855_v12, %s4715_s10 }
 0x149   :  { %913 = vrot.lane.b32.xlu1 %v4865_v13, %s4711_s8  ;;  %730 = vrot.lane.b32.xlu0 %v4855_v12, %s4716_s11 }
 0x14d   :  { %1076 = vrot.lane.b32.xlu1 %v4865_v13, %s4710_s4  ;;  %1078 = vrot.lane.b32.xlu0 %v4865_v13, %s4713_s21 }
 0x151   :  { %1241 = vrot.lane.b32.xlu1 %v4865_v13, %s4715_s10  ;;  %1243 = vrot.lane.b32.xlu0 %v4865_v13, %s4712_s3 }
 0x155   :  { %1406 = vrot.lane.b32.xlu1 %v4865_v13, %s4716_s11  ;;  %1408 = vrot.lane.b32.xlu0 %v4865_v13, %s4714_s9 }
 0x159   :  { %489 = vrot.lane.b32.xlu1 %v4855_v12, %s4717_s12  ;;  %324 = vrot.lane.b32.xlu0 %v4855_v12, %s4704_s17 }
 0x1af   :  { %v401_v14 = vpop.permute.xlu1 %400  ;;  %v237_v15 = vpop.permute.xlu0 %236 }
 0x1b0   :  { %3988 = vmatpush3.xpose.msk.msra.mxu0 %vm238_vm2, %v237_v15 }
 0x1b1   :  { %3997 = vmatprep.subr.mxu0 %v4708_v8 }
 0x1b3   :  { %v568_v16 = vpop.permute.xlu1 %567  ;;  %3990 = vmatmul.mubr.msk.f32.vlgmr.msra.gmra.mrb[2].mxu0 %vm238_vm2, %v4855_v12  ;;  %v403_v17 = vpop.permute.xlu0 %402 }
 0x1b4   :  { %3998 = vmatpush3.xpose.msk.msra.mxu0 %vm238_vm2, %v403_v17  ;;  %3999 = vmatprep.mubr.msk.f32.mxu0 %vm4709_vm1, %v4708_v8 }
 0x1b5   :  { %4007 = vmatprep.subr.mxu0 %v4708_v8 }
 0x1b7   :  { %v733_v18 = vpop.permute.xlu1 %732  ;;  %4000 = vmatmul.mubr.msk.f32.vlgmr.msra.gmra.mrb[4].mxu0 %vm238_vm2, %v401_v14  ;;  %v566_v19 = vpop.permute.xlu0 %565 }
 0x1b8   :  { %4008 = vmatpush3.xpose.msk.msra.mxu0 %vm238_vm2, %v568_v16  ;;  %4009 = vmatprep.mubr.msk.f32.mxu0 %vm4709_vm1, %v4708_v8 }
 0x1b9   :  { %4017 = vmatprep.subr.mxu0 %v4708_v8 }
 0x1bb   :  { %4010 = vmatmul.mubr.msk.f32.vlgmr.msra.gmra.mrb[6].mxu0 %vm238_vm2, %v566_v19  ;;  %v731_v20 = vpop.permute.xlu0 %730  ;;  %v914_v21 = vpop.permute.xlu1 %913 }
 0x1bc   :  { %4018 = vmatpush3.xpose.msk.msra.mxu0 %vm238_vm2, %v733_v18  ;;  %4019 = vmatprep.mubr.msk.f32.mxu0 %vm4709_vm1, %v4708_v8 }
 0x1bd   :  { %4027 = vmatprep.subr.mxu0 %v4708_v8 }
 0x1bf   :  { %4020 = vmatmul.mubr.msk.f32.vlgmr.msra.gmra.mrb[8].mxu0 %vm238_vm2, %v731_v20  ;;  %v1079_v22 = vpop.permute.xlu0 %1078  ;;  %v1077_v23 = vpop.permute.xlu1 %1076 }
 0x1c0   :  { %4028 = vmatpush3.xpose.msk.msra.mxu0 %vm238_vm2, %v914_v21  ;;  %4029 = vmatprep.mubr.msk.f32.mxu0 %vm4709_vm1, %v4708_v8 }
 0x1c1   :  { %4037 = vmatprep.subr.mxu0 %v4708_v8 }
 0x1c3   :  { %4030 = vmatmul.mubr.msk.f32.vlgmr.msra.gmra.mrb[10].mxu0 %vm238_vm2, %v4865_v13  ;;  %v1244_v24 = vpop.permute.xlu0 %1243  ;;  %v1242_v26 = vpop.permute.xlu1 %1241 }
 0x1c4   :  { %4038 = vmatpush3.xpose.msk.msra.mxu0 %vm238_vm2, %v1079_v22  ;;  %4039 = vmatprep.mubr.msk.f32.mxu0 %vm4709_vm1, %v4708_v8 }
 0x1c5   :  { %4047 = vmatprep.subr.mxu0 %v4708_v8 }
 0x1c7   :  { %4040 = vmatmul.mubr.msk.f32.vlgmr.msra.gmra.mrb[12].mxu0 %vm238_vm2, %v1077_v23  ;;  %v1409_v25 = vpop.permute.xlu0 %1408  ;;  %v1407_v28 = vpop.permute.xlu1 %1406 }
 0x1c8   :  { %4048 = vmatpush3.xpose.msk.msra.mxu0 %vm238_vm2, %v1244_v24  ;;  %4049 = vmatprep.mubr.msk.f32.mxu0 %vm4709_vm1, %v4708_v8 }
 0x1c9   :  { %4057 = vmatprep.subr.mxu0 %v4708_v8 }
 0x1cb   :  { %4050 = vmatmul.mubr.msk.f32.vlgmr.msra.gmra.mrb[14].mxu0 %vm238_vm2, %v1242_v26  ;;  %v325_v27 = vpop.permute.xlu0 %324  ;;  %v4935_v53 = vpop.permute.xlu1 %489 }
 0x1cc   :  { %3993 = vmatpush3.msra.mxu1 %v325_v27  ;;  %4058 = vmatpush3.xpose.msk.msra.mxu0 %vm238_vm2, %v1409_v25 }
 0x1cd   :  { %4059 = vmatprep.mubr.msk.f32.mxu0 %vm4709_vm1, %v4708_v8  ;;  %4002 = vmatprep.subr.mxu1 %v4708_v8 }
 0x1cf   :  { %4060 = vmatmul.mubr.msk.f32.vlgmr.msra.gmra.mrb[16].mxu0 %vm238_vm2, %v1407_v28 }
 0x286   :  { %v309_v29 = vpop.f32.mrb[2].mxu0 }
 0x287   :  { %v3991_v30 = vpop.f32.mrb[3].mxu0  ;;  %v313_v31 = vsel %vm238_vm2, %v309_v29, -inf }
 0x288   :  { %314 = vmax.xlane.f32.xlu0 %v313_v31 }
 0x28a   :  { %v474_v32 = vpop.f32.mrb[4].mxu0 }
 0x28b   :  { %v4001_v33 = vpop.f32.mrb[5].mxu0  ;;  %v478_v34 = vsel %vm238_vm2, %v474_v32, -inf }
 0x28c   :  { %479 = vmax.xlane.f32.xlu1 %v478_v34 }
 0x28e   :  { %v639_v35 = vpop.f32.mrb[6].mxu0 }
 0x28f   :  { %v4011_v36 = vpop.f32.mrb[7].mxu0  ;;  %v643_v37 = vsel %vm238_vm2, %v639_v35, -inf }
 0x290   :  { %644 = vmax.xlane.f32.xlu0 %v643_v37 }
 0x292   :  { %v804_v38 = vpop.f32.mrb[8].mxu0 }
 0x293   :  { %v4021_v39 = vpop.f32.mrb[9].mxu0  ;;  %v808_v40 = vsel %vm238_vm2, %v804_v38, -inf }
 0x294   :  { %809 = vmax.xlane.f32.xlu0 %v808_v40 }
 0x296   :  { %v985_v41 = vpop.f32.mrb[10].mxu0 }
 0x297   :  { %v4031_v42 = vpop.f32.mrb[11].mxu0  ;;  %v989_v43 = vsel %vm238_vm2, %v985_v41, -inf }
 0x298   :  { %990 = vmax.xlane.f32.xlu1 %v989_v43 }
 0x29a   :  { %v1150_v44 = vpop.f32.mrb[12].mxu0 }
 0x29b   :  { %v4041_v45 = vpop.f32.mrb[13].mxu0  ;;  %v1154_v46 = vsel %vm238_vm2, %v1150_v44, -inf }
 0x29c   :  { %1155 = vmax.xlane.f32.xlu0 %v1154_v46 }
 0x29e   :  { %v1315_v47 = vpop.f32.mrb[14].mxu0 }
 0x29f   :  { %v4051_v48 = vpop.f32.mrb[15].mxu0  ;;  %v1319_v49 = vsel %vm238_vm2, %v1315_v47, -inf }
 0x2a0   :  { %1320 = vmax.xlane.f32.xlu1 %v1319_v49 }
 0x2a2   :  { %v1480_v50 = vpop.f32.mrb[16].mxu0 }
 0x2a3   :  { %v4061_v51 = vpop.f32.mrb[17].mxu0  ;;  %v1484_v52 = vsel %vm238_vm2, %v1480_v50, -inf }
 0x2a4   :  { %1485 = vmax.xlane.f32.xlu0 %v1484_v52 }
 0x2b1   :  { %819 = vrot.lane.b32.xlu1 %v4855_v12, %s4718_s13 }
 0x2ba   :  { %654 = vrot.lane.b32.xlu0 %v4855_v12, %s4719_s14 }
 0x315   :  { %v315_v54 = vpop.xlane.xlu0 %314 }
 0x316   :  { %v316_v55 = vsub.f32 %v309_v29, %v315_v54 }
 0x318   :  { %v317_v56 = vmul.f32 1.442695, %v316_v55 }
 0x319   :  { %v480_v57 = vpop.xlane.xlu1 %479 }
 0x31a   :  { %4483 = vpow2.f32 %v317_v56  ;;  %v481_v58 = vsub.f32 %v474_v32, %v480_v57 }
 0x31c   :  { %v482_v59 = vmul.f32 1.442695, %v481_v58 }
 0x31d   :  { %v645_v60 = vpop.xlane.xlu0 %644 }
 0x31e   :  { %4485 = vpow2.f32 %v482_v59  ;;  %v646_v61 = vsub.f32 %v639_v35, %v645_v60 }
 0x320   :  { %v647_v62 = vmul.f32 1.442695, %v646_v61 }
 0x321   :  { %v810_v63 = vpop.xlane.xlu0 %809 }
 0x322   :  { %4487 = vpow2.f32 %v647_v62  ;;  %v811_v0 = vsub.f32 %v804_v38, %v810_v63 }
 0x324   :  { %v4484_v1 = vpop.eup %4483  ;;  %v812_v2 = vmul.f32 1.442695, %v811_v0 }
 0x325   :  { %v319_v3 = vsel %vm238_vm2, %v4484_v1, 0.0  ;;  %v991_v14 = vpop.xlane.xlu1 %990 }
 0x326   :  { %4489 = vpow2.f32 %v812_v2  ;;  %320 = vadd.xlane.f32.xlu1 %v319_v3  ;;  %v992_v15 = vsub.f32 %v985_v41, %v991_v14  ;;  %v117_v14 = vld [vmem:[#allocation8 + $0xa0] sm:$0xff] }
 0x328   :  { %v4486_v4 = vpop.eup %4485  ;;  %v993_v19 = vmul.f32 1.442695, %v992_v15  ;;  %v118_v15 = vld [vmem:[#allocation8 + $0xe0] sm:$0xff] }
 0x329   :  { %v484_v6 = vsel %vm238_vm2, %v4486_v4, 0.0  ;;  %v1156_v16 = vpop.xlane.xlu0 %1155 }
 0x32a   :  { %485 = vadd.xlane.f32.xlu0 %v484_v6  ;;  %v1157_v18 = vsub.f32 %v1150_v44, %v1156_v16  ;;  %4491 = vpow2.f32 %v993_v19  ;;  %v4282_v16 = vpack.c.bf16 %v118_v15, %v117_v14 }
 0x32c   :  { %v4488_v9 = vpop.eup %4487  ;;  %v1158_v22 = vmul.f32 1.442695, %v1157_v18 }
 0x32d   :  { %v649_v10 = vsel %vm238_vm2, %v4488_v9, 0.0  ;;  %v1321_v17 = vpop.xlane.xlu1 %1320 }
 0x32e   :  { %650 = vadd.xlane.f32.xlu1 %v649_v10  ;;  %v1322_v20 = vsub.f32 %v1315_v47, %v1321_v17  ;;  %4493 = vpow2.f32 %v1158_v22  ;;  %v115_v10 = vld [vmem:[#allocation8 + $0x20] sm:$0xff] }
 0x330   :  { %v4940_v11 = vpop.eup %4489  ;;  %v1323_v23 = vmul.f32 1.442695, %v1322_v20 }
 0x331   :  { %v814_v12 = vsel %vm238_vm2, %v4940_v11, 0.0  ;;  %v1486_v21 = vpop.xlane.xlu0 %1485  ;;  %v820_v34 = vpop.permute.xlu1 %819 }
 0x332   :  { %815 = vadd.xlane.f32.xlu0 %v814_v12  ;;  %v1487_v24 = vsub.f32 %v1480_v50, %v1486_v21  ;;  %4495 = vpow2.f32 %v1323_v23 }
 0x334   :  { %v1488_v25 = vmul.f32 1.442695, %v1487_v24  ;;  %v4492_v26 = vpop.eup %4491 }
 0x335   :  { %v995_v28 = vsel %vm238_vm2, %v4492_v26, 0.0  ;;  %v655_v35 = vpop.permute.xlu0 %654 }
 0x336   :  { %4497 = vpow2.f32 %v1488_v25 }
 0x338   :  { %v4948_v27 = vpop.eup %4493 }
 0x339   :  { %v1160_v31 = vsel %vm238_vm2, %v4948_v27, 0.0 }
 0x33c   :  { %v4951_v29 = vpop.eup %4495 }
 0x33d   :  { %v1325_v30 = vsel %vm238_vm2, %v4951_v29, 0.0 }
 0x33f   :  { %1165 = vrot.lane.b32.xlu1 %v4865_v13, %s4717_s12 }
 0x340   :  { %v4957_v32 = vpop.eup %4497 }
 0x341   :  { %v1490_v33 = vsel %vm238_vm2, %v4957_v32, 0.0 }
 0x348   :  { %1000 = vrot.lane.b32.xlu0 %v4865_v13, %s4704_s17  ;;  %s4720_s17 = smov 16  }
 0x363   :  { %996 = vadd.xlane.f32.xlu1 %v995_v28 }
 0x367   :  { %1326 = vadd.xlane.f32.xlu1 %v1325_v30  ;;  %1161 = vadd.xlane.f32.xlu0 %v1160_v31 }
 0x36b   :  { %1491 = vadd.xlane.f32.xlu1 %v1490_v33 }
 0x37c   :  { %1495 = vrot.lane.b32.xlu1 %v4865_v13, %s4718_s13 }
 0x37d   :  { %1330 = vrot.lane.b32.xlu0 %v4865_v13, %s4719_s14 }
 0x3b3   :  { %v321_v36 = vpop.xlane.xlu1 %320 }
 0x3b4   :  { %4499 = vrcp.f32 %v321_v36 }
 0x3b7   :  { %v486_v37 = vpop.xlane.xlu0 %485 }
 0x3b8   :  { %4501 = vrcp.f32 %v486_v37  ;;  %v3777_v37 = vld [vmem:[#allocation10 + $0x4] ss:$0 sm:$0xff] }
 0x3bb   :  { %v651_v38 = vpop.xlane.xlu1 %650 }
 0x3bc   :  { %4503 = vrcp.f32 %v651_v38 }
 0x3be   :  { %v4500_v39 = vpop.eup %4499 }
 0x3bf   :  { %v816_v40 = vpop.xlane.xlu0 %815  ;;  %v323_v41 = vmul.f32 %v4500_v39, %v4484_v1  ;;  %v1166_v48 = vpop.permute.xlu1 %1165 }
 0x3c0   :  { %4505 = vrcp.f32 %v816_v40 }
 0x3c1   :  { %3995 = vmatmul.mubr.msk.f32.vlgmr.msra.gmra.mrb[0].mxu1 %vm238_vm2, %v323_v41 }
 0x3c2   :  { %v4502_v42 = vpop.eup %4501  ;;  %4003 = vmatpush3.msra.mxu1 %v4935_v53  ;;  %4004 = vmatprep.mubr.msk.f32.mxu1 %vm4709_vm1, %v4708_v8 }
 0x3c3   :  { %v488_v13 = vmul.f32 %v4502_v42, %v4486_v4  ;;  %4012 = vmatprep.subr.mxu1 %v4708_v8  ;;  %v1001_v47 = vpop.permute.xlu0 %1000 }
 0x3c5   :  { %4005 = vmatmul.mubr.msk.f32.vlgmr.msra.gmra.mrb[2].mxu1 %vm238_vm2, %v488_v13 }
 0x3c6   :  { %v4504_v43 = vpop.eup %4503  ;;  %4013 = vmatpush3.msra.mxu1 %v655_v35  ;;  %4014 = vmatprep.mubr.msk.f32.mxu1 %vm4709_vm1, %v4708_v8 }
 0x3c7   :  { %v653_v44 = vmul.f32 %v4504_v43, %v4488_v9  ;;  %4022 = vmatprep.subr.mxu1 %v4708_v8 }
 0x3c9   :  { %4015 = vmatmul.mubr.msk.f32.vlgmr.msra.gmra.mrb[4].mxu1 %vm238_vm2, %v653_v44 }
 0x3ca   :  { %v4506_v45 = vpop.eup %4505  ;;  %4023 = vmatpush3.msra.mxu1 %v820_v34  ;;  %4024 = vmatprep.mubr.msk.f32.mxu1 %vm4709_vm1, %v4708_v8 }
 0x3cb   :  { %v818_v46 = vmul.f32 %v4506_v45, %v4940_v11  ;;  %4032 = vmatprep.subr.mxu1 %v4708_v8  ;;  %v116_v11 = vld [vmem:[#allocation8 + $0x60] sm:$0xff] }
 0x3cc   :  { %v4278_v12 = vpack.c.bf16 %v116_v11, %v115_v10 }
 0x3cd   :  { %4025 = vmatmul.mubr.msk.f32.vlgmr.msra.gmra.mrb[6].mxu1 %vm238_vm2, %v818_v46 }
 0x3ce   :  { %4033 = vmatpush3.msra.mxu1 %v1001_v47  ;;  %4034 = vmatprep.mubr.msk.f32.mxu1 %vm4709_vm1, %v4708_v8 }
 0x3cf   :  { %4042 = vmatprep.subr.mxu1 %v4708_v8  ;;  %4279 = vmatprep.subr.bf16.mxu0 %v4278_v12 }
 0x3d0   :  { %4281 = vmatpush3.bf16.msra.mxu0 %v4278_v12 }
 0x3d1   :  { %4283 = vmatprep.subr.bf16.mxu0 %v4282_v16 }
 0x3d4   :  { %4285 = vmatpush3.bf16.msra.mxu0 %v4282_v16  ;;  %v3780_v16 = vld [vmem:[#allocation10 + $0x6] ss:$0 sm:$0xff] }
 0x3f0   :  { %v997_v49 = vpop.xlane.xlu1 %996 }
 0x3f1   :  { %4507 = vrcp.f32 %v997_v49 }
 0x3f4   :  { %v1327_v50 = vpop.xlane.xlu1 %1326  ;;  %v1162_v51 = vpop.xlane.xlu0 %1161 }
 0x3f5   :  { %4509 = vrcp.f32 %v1162_v51 }
 0x3f6   :  { %4511 = vrcp.f32 %v1327_v50 }
 0x3f8   :  { %v1492_v52 = vpop.xlane.xlu1 %1491  ;;  %v1331_v58 = vpop.permute.xlu0 %1330 }
 0x3f9   :  { %4513 = vrcp.f32 %v1492_v52 }
 0x3fb   :  { %v4508_v53 = vpop.eup %4507 }
 0x3fc   :  { %v999_v54 = vmul.f32 %v4508_v53, %v4492_v26  ;;  %v1496_v61 = vpop.permute.xlu1 %1495  ;;  %v107_v53 = vld [vmem:[#allocation8 + $0x10] sm:$0xff] }
 0x3fe   :  { %4035 = vmatmul.mubr.msk.f32.vlgmr.msra.gmra.mrb[8].mxu1 %vm238_vm2, %v999_v54  ;;  %v108_v54 = vld [vmem:[#allocation8 + $0x50] sm:$0xff] }
 0x3ff   :  { %4043 = vmatpush3.msra.mxu1 %v1166_v48  ;;  %4044 = vmatprep.mubr.msk.f32.mxu1 %vm4709_vm1, %v4708_v8  ;;  %v4510_v55 = vpop.eup %4509 }
 0x400   :  { %4052 = vmatprep.subr.mxu1 %v4708_v8  ;;  %v1164_v56 = vmul.f32 %v4510_v55, %v4948_v27  ;;  %v4512_v57 = vpop.eup %4511  ;;  %v4294_v55 = vpack.c.bf16 %v108_v54, %v107_v53 }
 0x401   :  { %v1329_v59 = vmul.f32 %v4512_v57, %v4951_v29  ;;  %v110_v57 = vld [vmem:[#allocation8 + $0xd0] sm:$0xff] }
 0x402   :  { %4045 = vmatmul.mubr.msk.f32.vlgmr.msra.gmra.mrb[10].mxu1 %vm238_vm2, %v1164_v56  ;;  %4295 = vmatprep.subr.bf16.mxu0 %v4294_v55  ;;  %v109_v56 = vld [vmem:[#allocation8 + $0x90] sm:$0xff] }
 0x403   :  { %4053 = vmatpush3.msra.mxu1 %v1331_v58  ;;  %4054 = vmatprep.mubr.msk.f32.mxu1 %vm4709_vm1, %v4708_v8  ;;  %v4514_v60 = vpop.eup %4513  ;;  %v4298_v58 = vpack.c.bf16 %v110_v57, %v109_v56 }
 0x404   :  { %4062 = vmatprep.subr.mxu1 %v4708_v8  ;;  %v1494_v62 = vmul.f32 %v4514_v60, %v4957_v32  ;;  %v92_v60 = vld [vmem:[#allocation5 + $0x8] sm:$0xff] }
 0x406   :  { %4055 = vmatmul.mubr.msk.f32.vlgmr.msra.gmra.mrb[12].mxu1 %vm238_vm2, %v1329_v59  ;;  %v91_v59 = vld [vmem:[#allocation5] sm:$0xff] }
 0x407   :  { %4063 = vmatpush3.msra.mxu1 %v1496_v61  ;;  %4064 = vmatprep.mubr.msk.f32.mxu1 %vm4709_vm1, %v4708_v8  ;;  %v103_v61 = vld [vmem:[#allocation8 + $0x8] sm:$0xff] }
 0x40a   :  { %4065 = vmatmul.mubr.msk.f32.vlgmr.msra.gmra.mrb[14].mxu1 %vm238_vm2, %v1494_v62  ;;  %v104_v62 = vld [vmem:[#allocation8 + $0x48] sm:$0xff] }
 0x494   :  { %v396_v63 = vpop.f32.mrb[0].mxu1 }
 0x495   :  { %v3996_v0 = vpop.f32.mrb[1].mxu1 }
 0x496   :  { %v105_v0 = vld [vmem:[#allocation8 + $0x88] sm:$0xff] }
 0x498   :  { %v561_v1 = vpop.f32.mrb[2].mxu1 }
 0x499   :  { %896 = vrot.lane.b32.xlu0 %v561_v1, %s4702_s6  ;;  %v4006_v2 = vpop.f32.mrb[3].mxu1  ;;  %v106_v1 = vld [vmem:[#allocation8 + $0xc8] sm:$0xff] }
 0x49a   :  { %v4290_v2 = vpack.c.bf16 %v106_v1, %v105_v0 }
 0x49c   :  { %v726_v3 = vpop.f32.mrb[4].mxu1 }
 0x49d   :  { %900 = vrot.lane.b32.xlu1 %v726_v3, %s4720_s17  ;;  %v4016_v4 = vpop.f32.mrb[5].mxu1  ;;  %v4722_v3 = vmov 0.0|0.0  }
 0x49e   :  { %v93_v4 = vld [vmem:[#allocation5 + $0x10] sm:$0xff] }
 0x4a0   :  { %v891_v6 = vpop.f32.mrb[6].mxu1 }
 0x4a1   :  { %904 = vrot.lane.b32.xlu1 %v891_v6, %s4721_s15  ;;  %v4026_v9 = vpop.f32.mrb[7].mxu1 }
 0x4d1   :  { %v1072_v17 = vpop.f32.mrb[8].mxu1 }
 0x4d2   :  { %v4036_v18 = vpop.f32.mrb[9].mxu1 }
 0x4d5   :  { %v1237_v19 = vpop.f32.mrb[10].mxu1 }
 0x4d6   :  { %1572 = vrot.lane.b32.xlu0 %v1237_v19, %s4702_s6  ;;  %v4046_v20 = vpop.f32.mrb[11].mxu1 }
 0x4d7   :  { %v3781_v20 = vld [vmem:[#allocation10 + $0x7] ss:$0 sm:$0xff] }
 0x4d9   :  { %v1402_v21 = vpop.f32.mrb[12].mxu1 }
 0x4da   :  { %1576 = vrot.lane.b32.xlu0 %v1402_v21, %s4720_s17  ;;  %v4056_v22 = vpop.f32.mrb[13].mxu1 }
 0x4dd   :  { %v1567_v23 = vpop.f32.mrb[14].mxu1 }
 0x4de   :  { %1580 = vrot.lane.b32.xlu1 %v1567_v23, %s4721_s15  ;;  %v4066_v24 = vpop.f32.mrb[15].mxu1 }
 0x50b   :  { %v897_v25 = vpop.permute.xlu0 %896 }
 0x50c   :  { %v907_v27 = vsel %vm238_vm2, %v396_v63, %v897_v25  ;;  %v4286_v63 = vpack.c.bf16 %v104_v62, %v103_v61 }
 0x50e   :  { %4287 = vmatprep.subr.bf16.mxu1 %v4286_v63 }
 0x50f   :  { %v901_v26 = vpop.permute.xlu1 %900  ;;  %4289 = vmatpush3.bf16.msra.mxu1 %v4286_v63 }
 0x510   :  { %v909_v28 = vsel %vm908_vm3, %v907_v27, %v901_v26  ;;  %4291 = vmatprep.subr.bf16.mxu1 %v4290_v2  ;;  %v5030_v27 = vld [vmem:[#allocation10 + $0x2] ss:$0 sm:$0xff] }
 0x513   :  { %v905_v29 = vpop.permute.xlu1 %904  ;;  %4293 = vmatpush3.bf16.msra.mxu1 %v4290_v2  ;;  %v3790_v2 = vld [vmem:[#allocation10 + $0x3] ss:$0 sm:$0xff] }
 0x514   :  { %v911_v30 = vsel %vm910_vm4, %v909_v28, %v905_v29 }
 0x515   :  { %4075 = vmatprep.mubr.msk.f32.mxu0 %vm153_vm0, %v911_v30 }
 0x548   :  { %v1573_v31 = vpop.permute.xlu0 %1572 }
 0x549   :  { %v1583_v33 = vsel %vm238_vm2, %v1072_v17, %v1573_v31 }
 0x54c   :  { %v1577_v32 = vpop.permute.xlu0 %1576 }
 0x54d   :  { %v1584_v34 = vsel %vm908_vm3, %v1583_v33, %v1577_v32  ;;  %v94_v33 = vld [vmem:[#allocation5 + $0x18] sm:$0xff] }
 0x550   :  { %v1581_v35 = vpop.permute.xlu1 %1580 }
 0x551   :  { %v1585_v36 = vsel %vm910_vm4, %v1584_v34, %v1581_v35  ;;  %v111_v34 = vld [vmem:[#allocation8 + $0x18] sm:$0xff] }
 0x552   :  { %4076 = vmatmul.mubr.msk.f32.vlgmr.msra.gmra.mrb[18].mxu0 %vm153_vm0, %v1585_v36  ;;  %v112_v35 = vld [vmem:[#allocation8 + $0x58] sm:$0xff] }
 0x553   :  { %4297 = vmatpush3.bf16.msra.mxu0 %v4294_v55  ;;  %4097 = vmatprep.mubr.msk.f32.mxu0 %vm153_vm0, %v91_v59  ;;  %v113_v36 = vld [vmem:[#allocation8 + $0x98] sm:$0xff] }
 0x554   :  { %4299 = vmatprep.subr.bf16.mxu0 %v4298_v58 }
 0x557   :  { %4301 = vmatpush3.bf16.msra.mxu0 %v4298_v58 }
 0x558   :  { %4310 = vmatprep.subr.bf16.mxu0 %v4722_v3 }
 0x55a   :  { %4098 = vmatmul.mubr.msk.f32.vlgmr.msra.gmra.mrb[20].mxu0 %vm153_vm0, %v92_v60 }
 0x55b   :  { %4100 = vmatprep.mubr.msk.f32.mxu0 %vm153_vm0, %v93_v4 }
 0x55e   :  { %4101 = vmatmul.mubr.msk.f32.gmra.mrb[22].mxu0 %vm153_vm0, %v94_v33 }
 0x55f   :  { %4121 = vmatprep.mubr.msk.f32.mxu0 %vm4709_vm1, %v4708_v8 }
 0x625   :  { %v4077_v38 = vpop.f32.mrb[18].mxu0 }
 0x626   :  { %v1668_v39 = vadd.f32 %v4077_v38, %v3777_v37  ;;  %v1662_v40 = vpop.f32.mrb[19].mxu0  ;;  %v114_v38 = vld [vmem:[#allocation8 + $0xd8] sm:$0xff] }
 0x627   :  { %v1663_v41 = vadd.f32 %v3777_v37, %v1662_v40  ;;  %v4302_v37 = vpack.c.bf16 %v112_v35, %v111_v34  ;;  %v4306_v40 = vpack.c.bf16 %v114_v38, %v113_v36 }
 0x628   :  { %v1674_v42 = vsel %vm153_vm0, %v1668_v39, 0.0 }
 0x629   :  { %1675 = vadd.xlane.f32.xlu1 %v1674_v42  ;;  %v1671_v13 = vsel %vm153_vm0, %v1663_v41, 0.0  ;;  %4303 = vmatprep.subr.bf16.mxu1 %v4302_v37 }
 0x62a   :  { %1672 = vadd.xlane.f32.xlu0 %v1671_v13 }
 0x62d   :  { %v4099_v28 = vpop.f32.mrb[20].mxu0 }
 0x62e   :  { %v1885_v29 = vadd.f32 %v4099_v28, %v5030_v27  ;;  %v1879_v30 = vpop.f32.mrb[21].mxu0 }
 0x6b6   :  { %v1676_v43 = vpop.xlane.xlu1 %1675 }
 0x6b7   :  { %v1679_v44 = vmul.f32 0.03125, %v1676_v43  ;;  %v1673_v45 = vpop.xlane.xlu0 %1672  ;;  %v3782_v43 = vld [vmem:[#allocation10 + $0x1] ss:$0 sm:$0xff] }
 0x6b8   :  { %v1678_v46 = vmul.f32 0.03125, %v1673_v45 }
 0x6b9   :  { %v1681_v47 = vsub.f32 %v1668_v39, %v1679_v44  ;;  %v95_v39 = vld [vmem:[#allocation7] sm:$0xff]  ;;  %v96_v44 = vld [vmem:[#allocation7 + $0x8] sm:$0xff] }
 0x6ba   :  { %v1680_v48 = vsub.f32 %v1663_v41, %v1678_v46 }
 0x6bb   :  { %v1683_v51 = vmul.f32 %v1681_v47, %v1681_v47 }
 0x6bc   :  { %v1682_v49 = vmul.f32 %v1680_v48, %v1680_v48 }
 0x6bd   :  { %v1687_v52 = vsel %vm153_vm0, %v1683_v51, 0.0 }
 0x6be   :  { %v1684_v50 = vsel %vm153_vm0, %v1682_v49, 0.0 }
 0x6bf   :  { %1685 = vadd.xlane.f32.xlu0 %v1684_v50  ;;  %v5066_v50 = vpop.f32.mrb[22].mxu0 }
 0x6c0   :  { %v5068_v51 = vpop.f32.mrb[23].mxu0 }
 0x6c3   :  { %1688 = vadd.xlane.f32.xlu0 %v1687_v52 }
 0x74c   :  { %v1686_v6 = vpop.xlane.xlu0 %1685 }
 0x74d   :  { %v1690_v9 = vmul.f32 0.03125, %v1686_v6 }
 0x74f   :  { %v1692_v10 = vadd.f32 1e-05, %v1690_v9 }
 0x750   :  { %v1689_v11 = vpop.xlane.xlu0 %1688 }
 0x751   :  { %4515 = vrsqrt.f32 %v1692_v10  ;;  %v1691_v12 = vmul.f32 0.03125, %v1689_v11  ;;  %v97_v11 = vld [vmem:[#allocation7 + $0x10] sm:$0xff] }
 0x753   :  { %v1693_v14 = vadd.f32 1e-05, %v1691_v12  ;;  %v98_v12 = vld [vmem:[#allocation7 + $0x18] sm:$0xff] }
 0x755   :  { %4517 = vrsqrt.f32 %v1693_v14 }
 0x75b   :  { %v4516_v15 = vpop.eup %4515 }
 0x75c   :  { %v1696_v17 = vmul.f32 %v4516_v15, %v1680_v48 }
 0x75e   :  { %v1702_v18 = vmul.f32 %v3780_v16, %v1696_v17 }
 0x75f   :  { %v4518_v19 = vpop.eup %4517 }
 0x760   :  { %v1697_v21 = vmul.f32 %v4518_v19, %v1681_v47  ;;  %v1704_v22 = vadd.f32 %v1702_v18, %v4841_v5  ;;  %v1880_v5 = vadd.f32 %v5030_v27, %v1879_v30 }
 0x762   :  { %v1703_v23 = vmul.f32 %v3780_v16, %v1697_v21  ;;  %v5021_v24 = vadd.f32 %v3781_v20, %v1704_v22  ;;  %v4311_v31 = vpack.c.bf16 %v1885_v29, %v1880_v5  ;;  %v5040_v32 = vpack.i.bf16 %v1885_v29, %v1880_v5 }
 0x764   :  { %v1705_v25 = vadd.f32 %v1703_v23, %v4845_v7  ;;  %4086 = vmatprep.mubr.msk.f32.mxu1 %vm153_vm0, %v5021_v24  ;;  %4424 = vrot.lane.b32.xlu1 %v5040_v32, %s4710_s4 }
 0x765   :  { %4313 = vmatpush3.bf16.xpose.msk.msra.mxu0 %vm5036_vm5, %v4311_v31 }
 0x766   :  { %v5026_v26 = vadd.f32 %v3781_v20, %v1705_v25  ;;  %4317 = vmatprep.subr.bf16.mxu0 %v4722_v3 }
 0x768   :  { %4087 = vmatmul.mubr.msk.f32.vlgmr.msra.gmra.mrb[16].mxu1 %vm153_vm0, %v5026_v26 }
 0x769   :  { %4111 = vmatprep.mubr.msk.f32.mxu1 %vm153_vm0, %v95_v39  ;;  %4305 = vmatpush3.bf16.msra.mxu1 %v4302_v37 }
 0x76a   :  { %4307 = vmatprep.subr.bf16.mxu1 %v4306_v40 }
 0x76d   :  { %4309 = vmatpush3.bf16.msra.mxu1 %v4306_v40 }
 0x76e   :  { %4314 = vmatprep.subr.bf16.mxu1 %v4722_v3 }
 0x770   :  { %4112 = vmatmul.mubr.msk.f32.vlgmr.msra.gmra.mrb[18].mxu1 %vm153_vm0, %v96_v44 }
 0x771   :  { %4114 = vmatprep.mubr.msk.f32.mxu1 %vm153_vm0, %v97_v11 }
 0x774   :  { %4115 = vmatmul.mubr.msk.f32.gmra.mrb[20].mxu1 %vm153_vm0, %v98_v12 }
 0x775   :  { %4128 = vmatprep.mubr.msk.f32.mxu1 %vm4709_vm1, %v4708_v8 }
 0x7d6   :  { %v4425_v41 = vpop.permute.xlu1 %4424 }
 0x7d7   :  { %v4427_v42 = vunpack.i.h.bf16 %v4425_v41  ;;  %v4426_v13 = vunpack.i.l.bf16 %v4425_v41 }
 0x7d9   :  { %v4318_v48 = vpack.c.bf16 %v4427_v42, %v4426_v13 }
 0x83b   :  { %v4088_v45 = vpop.f32.mrb[16].mxu1 }
 0x83c   :  { %v5052_v46 = vadd.f32 %v4088_v45, %v3782_v43  ;;  %v1788_v47 = vpop.f32.mrb[17].mxu1 }
 0x83d   :  { %v5054_v49 = vadd.f32 %v3782_v43, %v1788_v47 }
 0x83f   :  { %2162 = vrot.lane.b32.xlu0 %v5054_v49, %s4710_s4  ;;  %4122 = vmatmul.mubr.msk.f32.vlgmr.msra.gmra.mrb[24].mxu0 %vm238_vm2, %v5054_v49 }
 0x840   :  { %4320 = vmatpush3.bf16.xpose.msk.msra.mxu0 %vm5036_vm5, %v4318_v48  ;;  %4135 = vmatprep.mubr.msk.f32.mxu0 %vm4709_vm1, %v4708_v8 }
 0x841   :  { %4328 = vmatprep.subr.bf16.mxu0 %v4722_v3 }
 0x843   :  { %v4113_v56 = vpop.f32.mrb[18].mxu1 }
 0x844   :  { %v1980_v57 = vpop.f32.mrb[19].mxu1  ;;  %v1986_v4 = vadd.f32 %v4113_v56, %v3790_v2 }
 0x845   :  { %v1981_v6 = vadd.f32 %v3790_v2, %v1980_v57 }
 0x847   :  { %v4315_v9 = vpack.c.bf16 %v1986_v4, %v1981_v6  ;;  %v5076_v10 = vpack.i.bf16 %v1986_v4, %v1981_v6  ;;  %v4116_v29 = vpop.f32.mrb[20].mxu1 }
 0x848   :  { %v1990_v30 = vpop.f32.mrb[21].mxu1  ;;  %v1996_v39 = vadd.f32 %v4116_v29, %v3790_v2 }
 0x849   :  { %4316 = vmatpush3.bf16.msra.mxu1 %v4315_v9  ;;  %v1991_v40 = vadd.f32 %v3790_v2, %v1990_v30 }
 0x84a   :  { %4321 = vmatprep.subr.bf16.mxu1 %v4722_v3 }
 0x84b   :  { %v4343_v41 = vpack.c.bf16 %v1996_v39, %v1991_v40  ;;  %v5103_v42 = vpack.i.bf16 %v1996_v39, %v1991_v40 }
 0x8b1   :  { %v2163_v52 = vpop.permute.xlu0 %2162 }
 0x8b2   :  { %4136 = vmatmul.mubr.msk.f32.vlgmr.msra.gmra.mrb[26].mxu0 %vm238_vm2, %v2163_v52 }
 0x8b3   :  { %4156 = vmatprep.mubr.msk.f32.mxu0 %vm4709_vm1, %v4708_v8 }
 0x912   :  { %v2074_v53 = vpop.f32.mrb[24].mxu0 }
 0x913   :  { %v4123_v54 = vpop.f32.mrb[25].mxu0  ;;  %v2078_v55 = vsel %vm908_vm3, %v2074_v53, -inf }
 0x914   :  { %2079 = vmax.xlane.f32.xlu1 %v2078_v55 }
 0x985   :  { %v2240_v58 = vpop.f32.mrb[26].mxu0 }
 0x986   :  { %v4137_v59 = vpop.f32.mrb[27].mxu0  ;;  %v2244_v60 = vsel %vm908_vm3, %v2240_v58, -inf }
 0x987   :  { %2245 = vmax.xlane.f32.xlu0 %v2244_v60 }
 0x9a1   :  { %v2080_v61 = vpop.xlane.xlu1 %2079 }
 0x9a2   :  { %v2081_v62 = vsub.f32 %v2074_v53, %v2080_v61 }
 0x9a4   :  { %v2082_v63 = vmul.f32 1.442695, %v2081_v62 }
 0x9a6   :  { %4519 = vpow2.f32 %v2082_v63 }
 0x9b0   :  { %v4520_v0 = vpop.eup %4519 }
 0x9b1   :  { %v2084_v1 = vsel %vm908_vm3, %v4520_v0, 0.0 }
 0x9b2   :  { %2085 = vadd.xlane.f32.xlu1 %v2084_v1 }
 0x9c3   :  { %4429 = vrot.lane.b32.xlu1 %v5076_v10, %s4710_s4 }
 0x9c7   :  { %2336 = vrot.lane.b32.xlu1 %v5054_v49, %s4715_s10 }
 0xa14   :  { %v2246_v14 = vpop.xlane.xlu0 %2245 }
 0xa15   :  { %v2247_v15 = vsub.f32 %v2240_v58, %v2246_v14 }
 0xa17   :  { %v2248_v16 = vmul.f32 1.442695, %v2247_v15 }
 0xa19   :  { %4521 = vpow2.f32 %v2248_v16 }
 0xa23   :  { %v4522_v17 = vpop.eup %4521 }
 0xa24   :  { %v2250_v18 = vsel %vm908_vm3, %v4522_v17, 0.0 }
 0xa25   :  { %2251 = vadd.xlane.f32.xlu0 %v2250_v18 }
 0xa3b   :  { %4434 = vrot.lane.b32.xlu0 %v5040_v32, %s4715_s10 }
 0xa3f   :  { %v2086_v19 = vpop.xlane.xlu1 %2085 }
 0xa40   :  { %4523 = vrcp.f32 %v2086_v19 }
 0xa43   :  { %v4430_v20 = vpop.permute.xlu1 %4429 }
 0xa44   :  { %v4432_v21 = vunpack.i.h.bf16 %v4430_v20  ;;  %v4431_v22 = vunpack.i.l.bf16 %v4430_v20 }
 0xa46   :  { %v4322_v25 = vpack.c.bf16 %v4432_v21, %v4431_v22 }
 0xa47   :  { %v2337_v38 = vpop.permute.xlu1 %2336 }
 0xa4a   :  { %v4524_v23 = vpop.eup %4523 }
 0xa4b   :  { %v2088_v28 = vmul.f32 %v4524_v23, %v4520_v0 }
 0xa4d   :  { %4129 = vmatmul.mubr.msk.f32.vlgmr.msra.gmra.mrb[22].mxu1 %vm908_vm3, %v2088_v28  ;;  %v1890_v28 = vadd.f32 %v5030_v27, %v5068_v51 }
 0xa4e   :  { %4323 = vmatpush3.bf16.msra.mxu1 %v4322_v25  ;;  %4142 = vmatprep.mubr.msk.f32.mxu1 %vm4709_vm1, %v4708_v8 }
 0xa4f   :  { %4324 = vmatprep.subr.bf16.mxu1 %v4722_v3 }
 0xab2   :  { %v2252_v5 = vpop.xlane.xlu0 %2251 }
 0xab3   :  { %4525 = vrcp.f32 %v2252_v5 }
 0xab6   :  { %v4435_v31 = vpop.permute.xlu0 %4434 }
 0xab7   :  { %v4437_v33 = vunpack.i.h.bf16 %v4435_v31  ;;  %v4436_v34 = vunpack.i.l.bf16 %v4435_v31 }
 0xab9   :  { %v4325_v37 = vpack.c.bf16 %v4437_v33, %v4436_v34 }
 0xabd   :  { %v4526_v35 = vpop.eup %4525 }
 0xabe   :  { %v2254_v36 = vmul.f32 %v4526_v35, %v4522_v17 }
 0xac0   :  { %4143 = vmatmul.mubr.msk.f32.vlgmr.msra.gmra.mrb[24].mxu1 %vm908_vm3, %v2254_v36 }
 0xac1   :  { %4327 = vmatpush3.bf16.xpose.msk.msra.mxu1 %vm5036_vm5, %v4325_v37  ;;  %4149 = vmatprep.mubr.msk.f32.mxu1 %vm4709_vm1, %v4708_v8 }
 0xac2   :  { %4335 = vmatprep.subr.bf16.mxu1 %v4722_v3 }
 0xac8   :  { %4150 = vmatmul.mubr.msk.f32.vlgmr.msra.gmra.mrb[26].mxu1 %vm238_vm2, %v2337_v38 }
 0xac9   :  { %4170 = vmatprep.mubr.msk.f32.mxu1 %vm4709_vm1, %v4708_v8 }
 0xb20   :  { %v5105_v13 = vpop.f32.mrb[22].mxu1 }
 0xb21   :  { %v4130_v43 = vpop.f32.mrb[23].mxu1 }
 0xb93   :  { %v5107_v44 = vpop.f32.mrb[24].mxu1 }
 0xb94   :  { %v4144_v45 = vpop.f32.mrb[25].mxu1 }
 0xb9b   :  { %v2414_v47 = vpop.f32.mrb[26].mxu1 }
 0xb9c   :  { %v4151_v48 = vpop.f32.mrb[27].mxu1  ;;  %v2418_v52 = vsel %vm908_vm3, %v2414_v47, -inf }
 0xb9d   :  { %2419 = vmax.xlane.f32.xlu1 %v2418_v52 }
 0xbae   :  { %4444 = vrot.lane.b32.xlu1 %v5040_v32, %s4716_s11 }
 0xbb2   :  { %2508 = vrot.lane.b32.xlu1 %v5054_v49, %s4716_s11 }
 0xc2a   :  { %v2420_v53 = vpop.xlane.xlu1 %2419 }
 0xc2b   :  { %v2421_v54 = vsub.f32 %v2414_v47, %v2420_v53 }
 0xc2d   :  { %v2422_v55 = vmul.f32 1.442695, %v2421_v54 }
 0xc2e   :  { %v4445_v62 = vpop.permute.xlu1 %4444 }
 0xc2f   :  { %4527 = vpow2.f32 %v2422_v55  ;;  %v4447_v63 = vunpack.i.h.bf16 %v4445_v62  ;;  %v4446_v0 = vunpack.i.l.bf16 %v4445_v62 }
 0xc31   :  { %v4332_v2 = vpack.c.bf16 %v4447_v63, %v4446_v0 }
 0xc32   :  { %v2509_v4 = vpop.permute.xlu1 %2508 }
 0xc39   :  { %v4528_v56 = vpop.eup %4527 }
 0xc3a   :  { %v2424_v57 = vsel %vm908_vm3, %v4528_v56, 0.0 }
 0xc3b   :  { %2425 = vadd.xlane.f32.xlu0 %v2424_v57 }
 0xc51   :  { %4439 = vrot.lane.b32.xlu0 %v5076_v10, %s4715_s10 }
 0xcc8   :  { %v2426_v58 = vpop.xlane.xlu0 %2425 }
 0xcc9   :  { %4529 = vrcp.f32 %v2426_v58 }
 0xccc   :  { %v4440_v59 = vpop.permute.xlu0 %4439 }
 0xccd   :  { %v4442_v60 = vunpack.i.h.bf16 %v4440_v59  ;;  %v4441_v61 = vunpack.i.l.bf16 %v4440_v59 }
 0xccf   :  { %v4329_v32 = vpack.c.bf16 %v4442_v60, %v4441_v61 }
 0xcd1   :  { %4330 = vmatpush3.bf16.msra.mxu0 %v4329_v32 }
 0xcd2   :  { %4331 = vmatprep.subr.bf16.mxu0 %v4722_v3 }
 0xcd3   :  { %v4530_v49 = vpop.eup %4529 }
 0xcd4   :  { %v2428_v1 = vmul.f32 %v4530_v49, %v4528_v56 }
 0xcd6   :  { %4157 = vmatmul.mubr.msk.f32.vlgmr.msra.gmra.mrb[28].mxu0 %vm908_vm3, %v2428_v1 }
 0xcd7   :  { %4163 = vmatprep.mubr.msk.f32.mxu0 %vm4709_vm1, %v4708_v8 }
 0xcda   :  { %4334 = vmatpush3.bf16.xpose.msk.msra.mxu0 %vm5036_vm5, %v4332_v2 }
 0xcdb   :  { %4342 = vmatprep.subr.bf16.mxu0 %v4722_v3 }
 0xce1   :  { %4164 = vmatmul.mubr.msk.f32.vlgmr.msra.gmra.mrb[30].mxu0 %vm238_vm2, %v2509_v4 }
 0xce2   :  { %4344 = vmatpush3.bf16.msra.mxu0 %v4343_v41  ;;  %4184 = vmatprep.mubr.msk.f32.mxu0 %vm4709_vm1, %v4708_v8 }
 0xce3   :  { %4345 = vmatprep.subr.bf16.mxu0 %v4722_v3 }
 0xda9   :  { %v5128_v6 = vpop.f32.mrb[28].mxu0 }
 0xdaa   :  { %v4158_v9 = vpop.f32.mrb[29].mxu0 }
 0xdb4   :  { %v2586_v11 = vpop.f32.mrb[30].mxu0 }
 0xdb5   :  { %v4165_v12 = vpop.f32.mrb[31].mxu0  ;;  %v2590_v14 = vsel %vm908_vm3, %v2586_v11, -inf }
 0xdb6   :  { %2591 = vmax.xlane.f32.xlu0 %v2590_v14 }
 0xdcc   :  { %4449 = vrot.lane.b32.xlu0 %v5076_v10, %s4716_s11  ;;  %v1895_v10 = vadd.f32 %v5066_v50, %v5030_v27 }
 0xdce   :  { %v4339_v5 = vpack.c.bf16 %v1895_v10, %v1890_v28  ;;  %v5155_v39 = vpack.i.bf16 %v1895_v10, %v1890_v28 }
 0xdd0   :  { %2858 = vrot.lane.b32.xlu0 %v5052_v46, %s4710_s4 }
 0xe43   :  { %v2592_v15 = vpop.xlane.xlu0 %2591 }
 0xe44   :  { %v2593_v16 = vsub.f32 %v2586_v11, %v2592_v15 }
 0xe46   :  { %v2594_v17 = vmul.f32 1.442695, %v2593_v16 }
 0xe47   :  { %v4450_v18 = vpop.permute.xlu0 %4449 }
 0xe48   :  { %4531 = vpow2.f32 %v2594_v17  ;;  %v4452_v19 = vunpack.i.h.bf16 %v4450_v18  ;;  %v4451_v20 = vunpack.i.l.bf16 %v4450_v18 }
 0xe4a   :  { %v4336_v21 = vpack.c.bf16 %v4452_v19, %v4451_v20 }
 0xe4b   :  { %v2859_v53 = vpop.permute.xlu0 %2858 }
 0xe4c   :  { %4337 = vmatpush3.bf16.msra.mxu1 %v4336_v21 }
 0xe4d   :  { %4338 = vmatprep.subr.bf16.mxu1 %v4722_v3 }
 0xe52   :  { %v4532_v22 = vpop.eup %4531 }
 0xe53   :  { %v2596_v23 = vsel %vm908_vm3, %v4532_v22, 0.0 }
 0xe54   :  { %2597 = vadd.xlane.f32.xlu1 %v2596_v23 }
 0xee1   :  { %v2598_v25 = vpop.xlane.xlu1 %2597 }
 0xee2   :  { %4533 = vrcp.f32 %v2598_v25 }
 0xeec   :  { %v4534_v29 = vpop.eup %4533 }
 0xeed   :  { %v2600_v30 = vmul.f32 %v4534_v29, %v4532_v22 }
 0xeef   :  { %4171 = vmatmul.mubr.msk.f32.vlgmr.msra.gmra.mrb[28].mxu1 %vm908_vm3, %v2600_v30 }
 0xef0   :  { %4341 = vmatpush3.bf16.xpose.msk.msra.mxu1 %vm5036_vm5, %v4339_v5  ;;  %4177 = vmatprep.mubr.msk.f32.mxu1 %vm4709_vm1, %v4708_v8 }
 0xef1   :  { %4349 = vmatprep.subr.bf16.mxu1 %v4722_v3 }
 0xef7   :  { %4178 = vmatmul.mubr.msk.f32.vlgmr.msra.gmra.mrb[30].mxu1 %vm238_vm2, %v5052_v46 }
 0xef8   :  { %4198 = vmatprep.mubr.msk.f32.mxu1 %vm4709_vm1, %v4708_v8 }
 0xfc2   :  { %v5151_v27 = vpop.f32.mrb[28].mxu1 }
 0xfc3   :  { %v4172_v50 = vpop.f32.mrb[29].mxu1 }
 0xfca   :  { %v2770_v51 = vpop.f32.mrb[30].mxu1 }
 0xfcb   :  { %v4179_v31 = vpop.f32.mrb[31].mxu1  ;;  %v2774_v33 = vsel %vm908_vm3, %v2770_v51, -inf }
 0xfcc   :  { %2775 = vmax.xlane.f32.xlu1 %v2774_v33 }
0x1059   :  { %v2776_v34 = vpop.xlane.xlu1 %2775 }
0x105a   :  { %v2777_v35 = vsub.f32 %v2770_v51, %v2776_v34 }
0x105c   :  { %v2778_v36 = vmul.f32 1.442695, %v2777_v35 }
0x105e   :  { %4535 = vpow2.f32 %v2778_v36 }
0x1068   :  { %v4536_v37 = vpop.eup %4535 }
0x1069   :  { %v2780_v38 = vsel %vm908_vm3, %v4536_v37, 0.0 }
0x106a   :  { %2781 = vadd.xlane.f32.xlu1 %v2780_v38 }
0x107b   :  { %4454 = vrot.lane.b32.xlu1 %v5155_v39, %s4710_s4 }
0x10f7   :  { %v2782_v40 = vpop.xlane.xlu1 %2781 }
0x10f8   :  { %4537 = vrcp.f32 %v2782_v40 }
0x10fb   :  { %v4455_v41 = vpop.permute.xlu1 %4454 }
0x10fc   :  { %v4457_v43 = vunpack.i.h.bf16 %v4455_v41  ;;  %v4456_v45 = vunpack.i.l.bf16 %v4455_v41 }
0x10fe   :  { %v4346_v52 = vpack.c.bf16 %v4457_v43, %v4456_v45 }
0x1102   :  { %v4538_v47 = vpop.eup %4537 }
0x1103   :  { %v2784_v48 = vmul.f32 %v4538_v47, %v4536_v37 }
0x1105   :  { %4185 = vmatmul.mubr.msk.f32.vlgmr.msra.gmra.mrb[32].mxu0 %vm908_vm3, %v2784_v48 }
0x1106   :  { %4348 = vmatpush3.bf16.xpose.msk.msra.mxu0 %vm5036_vm5, %v4346_v52  ;;  %4191 = vmatprep.mubr.msk.f32.mxu0 %vm4709_vm1, %v4708_v8 }
0x1107   :  { %4356 = vmatprep.subr.bf16.mxu0 %v4722_v3 }
0x110d   :  { %4192 = vmatmul.mubr.msk.f32.vlgmr.msra.gmra.mrb[34].mxu0 %vm238_vm2, %v2859_v53 }
0x110e   :  { %4212 = vmatprep.mubr.msk.f32.mxu0 %vm4709_vm1, %v4708_v8 }
0x11d8   :  { %v5168_v54 = vpop.f32.mrb[32].mxu0 }
0x11d9   :  { %v4186_v55 = vpop.f32.mrb[33].mxu0 }
0x11e0   :  { %v2936_v56 = vpop.f32.mrb[34].mxu0 }
0x11e1   :  { %v4193_v57 = vpop.f32.mrb[35].mxu0  ;;  %v2940_v58 = vsel %vm908_vm3, %v2936_v56, -inf }
0x11e2   :  { %2941 = vmax.xlane.f32.xlu0 %v2940_v58 }
0x11f8   :  { %4459 = vrot.lane.b32.xlu0 %v5103_v42, %s4710_s4 }
0x11fc   :  { %3032 = vrot.lane.b32.xlu0 %v5052_v46, %s4715_s10 }
0x126f   :  { %v2942_v59 = vpop.xlane.xlu0 %2941 }
0x1270   :  { %v2943_v60 = vsub.f32 %v2936_v56, %v2942_v59 }
0x1272   :  { %v2944_v61 = vmul.f32 1.442695, %v2943_v60 }
0x1273   :  { %v4460_v32 = vpop.permute.xlu0 %4459 }
0x1274   :  { %4539 = vpow2.f32 %v2944_v61  ;;  %v4462_v62 = vunpack.i.h.bf16 %v4460_v32  ;;  %v4461_v49 = vunpack.i.l.bf16 %v4460_v32  ;;  %v119_v61 = vld [vmem:[#allocation8 + $0x28] sm:$0xff] }
0x1275   :  { %v120_v32 = vld [vmem:[#allocation8 + $0x68] sm:$0xff] }
0x1276   :  { %v4350_v63 = vpack.c.bf16 %v4462_v62, %v4461_v49  ;;  %v121_v62 = vld [vmem:[#allocation8 + $0xa8] sm:$0xff]  ;;  %v4366_v49 = vpack.c.bf16 %v120_v32, %v119_v61 }
0x1277   :  { %v3033_v16 = vpop.permute.xlu0 %3032 }
0x1278   :  { %4351 = vmatpush3.bf16.msra.mxu1 %v4350_v63  ;;  %v122_v63 = vld [vmem:[#allocation8 + $0xe8] sm:$0xff] }
0x1279   :  { %4352 = vmatprep.subr.bf16.mxu1 %v4722_v3 }
0x127e   :  { %v4540_v0 = vpop.eup %4539 }
0x127f   :  { %v2946_v1 = vsel %vm908_vm3, %v4540_v0, 0.0 }
0x1280   :  { %2947 = vadd.xlane.f32.xlu1 %v2946_v1 }
0x1291   :  { %4464 = vrot.lane.b32.xlu1 %v5155_v39, %s4715_s10 }
0x130d   :  { %v2948_v2 = vpop.xlane.xlu1 %2947 }
0x130e   :  { %4541 = vrcp.f32 %v2948_v2 }
0x1311   :  { %v4465_v4 = vpop.permute.xlu1 %4464 }
0x1312   :  { %v4467_v9 = vunpack.i.h.bf16 %v4465_v4  ;;  %v4466_v11 = vunpack.i.l.bf16 %v4465_v4 }
0x1314   :  { %v4353_v15 = vpack.c.bf16 %v4467_v9, %v4466_v11 }
0x1318   :  { %v4542_v12 = vpop.eup %4541 }
0x1319   :  { %v2950_v14 = vmul.f32 %v4542_v12, %v4540_v0  ;;  %v4370_v0 = vpack.c.bf16 %v122_v63, %v121_v62  ;;  %v133_v62 = vld [vmem:[#allocation8 + $0x1b8] sm:$0xff] }
0x131b   :  { %4199 = vmatmul.mubr.msk.f32.vlgmr.msra.gmra.mrb[32].mxu1 %vm908_vm3, %v2950_v14 }
0x131c   :  { %4355 = vmatpush3.bf16.xpose.msk.msra.mxu1 %vm5036_vm5, %v4353_v15  ;;  %4205 = vmatprep.mubr.msk.f32.mxu1 %vm4709_vm1, %v4708_v8  ;;  %v3827_v15 = vld [vmem:[#allocation10 + $0x5] ss:$0 sm:$0xff] }
0x131d   :  { %4363 = vmatprep.subr.bf16.mxu1 %v4722_v3 }
0x1323   :  { %4206 = vmatmul.mubr.msk.f32.vlgmr.msra.gmra.mrb[34].mxu1 %vm238_vm2, %v3033_v16 }
0x1324   :  { %4226 = vmatprep.mubr.msk.f32.mxu1 %vm4709_vm1, %v4708_v8 }
0x13ee   :  { %v3028_v17 = vpop.f32.mrb[32].mxu1 }
0x13ef   :  { %v4200_v18 = vpop.f32.mrb[33].mxu1 }
0x13f6   :  { %v3110_v19 = vpop.f32.mrb[34].mxu1 }
0x13f7   :  { %v4207_v20 = vpop.f32.mrb[35].mxu1  ;;  %v3114_v21 = vsel %vm908_vm3, %v3110_v19, -inf }
0x13f8   :  { %3115 = vmax.xlane.f32.xlu0 %v3114_v21 }
0x140e   :  { %4469 = vrot.lane.b32.xlu0 %v5103_v42, %s4715_s10 }
0x1412   :  { %3204 = vrot.lane.b32.xlu0 %v5052_v46, %s4716_s11 }
0x1485   :  { %v3116_v22 = vpop.xlane.xlu0 %3115 }
0x1486   :  { %v3117_v23 = vsub.f32 %v3110_v19, %v3116_v22 }
0x1488   :  { %v3118_v25 = vmul.f32 1.442695, %v3117_v23 }
0x1489   :  { %v4470_v10 = vpop.permute.xlu0 %4469 }
0x148a   :  { %4543 = vpow2.f32 %v3118_v25  ;;  %v4472_v28 = vunpack.i.h.bf16 %v4470_v10  ;;  %v4471_v29 = vunpack.i.l.bf16 %v4470_v10 }
0x148c   :  { %v4357_v30 = vpack.c.bf16 %v4472_v28, %v4471_v29 }
0x148e   :  { %4358 = vmatpush3.bf16.msra.mxu0 %v4357_v30 }
0x148f   :  { %4359 = vmatprep.subr.bf16.mxu0 %v4722_v3  ;;  %v3205_v3 = vpop.permute.xlu0 %3204 }
0x1494   :  { %v4544_v5 = vpop.eup %4543 }
0x1495   :  { %v3120_v50 = vsel %vm908_vm3, %v4544_v5, 0.0 }
0x1496   :  { %3121 = vadd.xlane.f32.xlu1 %v3120_v50 }
0x14a7   :  { %4474 = vrot.lane.b32.xlu1 %v5155_v39, %s4716_s11 }
0x1523   :  { %v3122_v51 = vpop.xlane.xlu1 %3121 }
0x1524   :  { %4545 = vrcp.f32 %v3122_v51  ;;  %v123_v51 = vld [vmem:[#allocation8 + $0x30] sm:$0xff] }
0x1527   :  { %v4475_v46 = vpop.permute.xlu1 %4474 }
0x1528   :  { %v4477_v31 = vunpack.i.h.bf16 %v4475_v46  ;;  %v4476_v33 = vunpack.i.l.bf16 %v4475_v46  ;;  %v124_v46 = vld [vmem:[#allocation8 + $0x70] sm:$0xff] }
0x152a   :  { %v4360_v36 = vpack.c.bf16 %v4477_v31, %v4476_v33  ;;  %v4374_v31 = vpack.c.bf16 %v124_v46, %v123_v51  ;;  %v125_v33 = vld [vmem:[#allocation8 + $0xb0] sm:$0xff] }
0x152e   :  { %v4546_v34 = vpop.eup %4545 }
0x152f   :  { %v3124_v35 = vmul.f32 %v4546_v34, %v4544_v5  ;;  %v126_v34 = vld [vmem:[#allocation8 + $0xf0] sm:$0xff] }
0x1531   :  { %4213 = vmatmul.mubr.msk.f32.vlgmr.msra.gmra.mrb[36].mxu0 %vm908_vm3, %v3124_v35  ;;  %v4378_v35 = vpack.c.bf16 %v126_v34, %v125_v33  ;;  %v3838_v33 = vld [vmem:[#allocation10 + $0xa] ss:$0 sm:$0xff] }
0x1532   :  { %4362 = vmatpush3.bf16.xpose.msk.msra.mxu0 %vm5036_vm5, %v4360_v36  ;;  %4219 = vmatprep.mubr.msk.f32.mxu0 %vm4709_vm1, %v4708_v8  ;;  %v127_v36 = vld [vmem:[#allocation8 + $0x38] sm:$0xff] }
0x1533   :  { %4375 = vmatprep.subr.bf16.mxu0 %v4374_v31 }
0x1539   :  { %4220 = vmatmul.mubr.msk.f32.vlgmr.msra.gmra.mrb[38].mxu0 %vm238_vm2, %v3205_v3  ;;  %v128_v3 = vld [vmem:[#allocation8 + $0x78] sm:$0xff] }
0x153a   :  { %4377 = vmatpush3.bf16.msra.mxu0 %v4374_v31 }
0x153b   :  { %4379 = vmatprep.subr.bf16.mxu0 %v4378_v35 }
0x153e   :  { %4381 = vmatpush3.bf16.msra.mxu0 %v4378_v35 }
0x1604   :  { %v3200_v37 = vpop.f32.mrb[36].mxu0 }
0x1605   :  { %v4214_v38 = vpop.f32.mrb[37].mxu0 }
0x1606   :  { %v4382_v38 = vpack.c.bf16 %v128_v3, %v127_v36 }
0x160c   :  { %v3282_v39 = vpop.f32.mrb[38].mxu0 }
0x160d   :  { %v4221_v40 = vpop.f32.mrb[39].mxu0  ;;  %v3286_v41 = vsel %vm908_vm3, %v3282_v39, -inf }
0x160e   :  { %3287 = vmax.xlane.f32.xlu1 %v3286_v41  ;;  %v131_v41 = vld [vmem:[#allocation8 + $0x138] sm:$0xff] }
0x161f   :  { %2681 = vrot.lane.b32.xlu1 %v5107_v44, %s4702_s6 }
0x1623   :  { %2685 = vrot.lane.b32.xlu1 %v5128_v6, %s4720_s17 }
0x1627   :  { %2689 = vrot.lane.b32.xlu1 %v5151_v27, %s4721_s15 }
0x169b   :  { %v3288_v8 = vpop.xlane.xlu1 %3287 }
0x169c   :  { %v3289_v7 = vsub.f32 %v3282_v39, %v3288_v8  ;;  %v130_v39 = vld [vmem:[#allocation8 + $0xf8] sm:$0xff] }
0x169d   :  { %v132_v8 = vld [vmem:[#allocation8 + $0x178] sm:$0xff] }
0x169e   :  { %v3290_v43 = vmul.f32 1.442695, %v3289_v7  ;;  %v4390_v7 = vpack.c.bf16 %v132_v8, %v131_v41 }
0x169f   :  { %v2682_v44 = vpop.permute.xlu1 %2681 }
0x16a0   :  { %4547 = vpow2.f32 %v3290_v43  ;;  %v2692_v58 = vsel %vm238_vm2, %v5105_v13, %v2682_v44 }
0x16a3   :  { %v2686_v27 = vpop.permute.xlu1 %2685 }
0x16a7   :  { %v2690_v57 = vpop.permute.xlu1 %2689 }
0x16aa   :  { %v4548_v45 = vpop.eup %4547 }
0x16ab   :  { %v3292_v47 = vsel %vm908_vm3, %v4548_v45, 0.0 }
0x16ac   :  { %3293 = vadd.xlane.f32.xlu0 %v3292_v47 }
0x16c2   :  { %4479 = vrot.lane.b32.xlu0 %v5103_v42, %s4716_s11  ;;  %v2693_v42 = vsel %vm908_vm3, %v2692_v58, %v2686_v27 }
0x16c3   :  { %v2694_v60 = vsel %vm910_vm4, %v2693_v42, %v2690_v57  ;;  %v3831_v57 = vld [vmem:[#allocation10 + $0x9] ss:$0 sm:$0xff] }
0x16c6   :  { %3377 = vrot.lane.b32.xlu0 %v3028_v17, %s4702_s6 }
0x16ca   :  { %3381 = vrot.lane.b32.xlu0 %v3200_v37, %s4720_s17  ;;  %v129_v37 = vld [vmem:[#allocation8 + $0xb8] sm:$0xff] }
0x16cb   :  { %v4386_v40 = vpack.c.bf16 %v130_v39, %v129_v37  ;;  %v3839_v37 = vld [vmem:[#allocation10 + $0xb] ss:$0 sm:$0xff] }
0x1739   :  { %v3294_v6 = vpop.xlane.xlu0 %3293 }
0x173a   :  { %4549 = vrcp.f32 %v3294_v6 }
0x173d   :  { %v4480_v48 = vpop.permute.xlu0 %4479 }
0x173e   :  { %v4482_v52 = vunpack.i.h.bf16 %v4480_v48  ;;  %v4481_v53 = vunpack.i.l.bf16 %v4480_v48 }
0x1740   :  { %v4364_v55 = vpack.c.bf16 %v4482_v52, %v4481_v53  ;;  %v3830_v52 = vld [vmem:[#allocation10 + $0x8] ss:$0 sm:$0xff] }
0x1741   :  { %v3378_v2 = vpop.permute.xlu0 %3377 }
0x1742   :  { %4365 = vmatpush3.bf16.msra.mxu1 %v4364_v55  ;;  %v3388_v9 = vsel %vm238_vm2, %v5168_v54, %v3378_v2 }
0x1743   :  { %4367 = vmatprep.subr.bf16.mxu1 %v4366_v49 }
0x1744   :  { %v4550_v56 = vpop.eup %4549 }
0x1745   :  { %v3296_v59 = vmul.f32 %v4550_v56, %v4548_v45  ;;  %v3382_v4 = vpop.permute.xlu0 %3381 }
0x1746   :  { %v3389_v11 = vsel %vm908_vm3, %v3388_v9, %v3382_v4 }
0x1747   :  { %4227 = vmatmul.mubr.msk.f32.vlgmr.msra.gmra.mrb[36].mxu1 %vm908_vm3, %v3296_v59 }
0x1748   :  { %4237 = vmatprep.mubr.msk.f32.mxu1 %vm153_vm0, %v2694_v60  ;;  %4369 = vmatpush3.bf16.msra.mxu1 %v4366_v49  ;;  %v134_v49 = vld [vmem:[#allocation8 + $0x1f8] sm:$0xff] }
0x1749   :  { %4371 = vmatprep.subr.bf16.mxu1 %v4370_v0  ;;  %v4394_v63 = vpack.c.bf16 %v134_v49, %v133_v62 }
0x174c   :  { %4373 = vmatpush3.bf16.msra.mxu1 %v4370_v0  ;;  %v3832_v0 = vld [vmem:[#allocation10 + $0xc] ss:$0 sm:$0xff] }
0x174d   :  { %4383 = vmatprep.subr.bf16.mxu1 %v4382_v38 }
0x181a   :  { %v3372_v13 = vpop.f32.mrb[36].mxu1 }
0x181b   :  { %3385 = vrot.lane.b32.xlu1 %v3372_v13, %s4721_s15  ;;  %v4228_v1 = vpop.f32.mrb[37].mxu1 }
0x188d   :  { %v3386_v12 = vpop.permute.xlu1 %3385 }
0x188e   :  { %v3390_v14 = vsel %vm910_vm4, %v3389_v11, %v3386_v12 }
0x188f   :  { %4238 = vmatmul.mubr.msk.f32.vlgmr.msra.gmra.mrb[38].mxu1 %vm153_vm0, %v3390_v14 }
0x1890   :  { %4385 = vmatpush3.bf16.msra.mxu1 %v4382_v38 }
0x1891   :  { %4387 = vmatprep.subr.bf16.mxu1 %v4386_v40 }
0x1894   :  { %4389 = vmatpush3.bf16.msra.mxu1 %v4386_v40 }
0x1895   :  { %4391 = vmatprep.subr.bf16.mxu1 %v4390_v7 }
0x1898   :  { %4393 = vmatpush3.bf16.msra.mxu1 %v4390_v7 }
0x1899   :  { %4395 = vmatprep.subr.bf16.mxu1 %v4394_v63 }
0x189c   :  { %4397 = vmatpush3.bf16.msra.mxu1 %v4394_v63 }
0x1962   :  { %v4239_v16 = vpop.f32.mrb[38].mxu1 }
0x1963   :  { %v3473_v17 = vadd.f32 %v4239_v16, %v3827_v15  ;;  %v3467_v18 = vpop.f32.mrb[39].mxu1 }
0x1964   :  { %v3468_v19 = vadd.f32 %v3827_v15, %v3467_v18 }
0x1965   :  { %v3479_v20 = vsel %vm153_vm0, %v3473_v17, 0.0 }
0x1966   :  { %3480 = vadd.xlane.f32.xlu1 %v3479_v20  ;;  %v3476_v21 = vsel %vm153_vm0, %v3468_v19, 0.0 }
0x1967   :  { %3477 = vadd.xlane.f32.xlu0 %v3476_v21 }
0x19f3   :  { %v3481_v22 = vpop.xlane.xlu1 %3480 }
0x19f4   :  { %v3483_v54 = vmul.f32 0.03125, %v3481_v22  ;;  %v3478_v23 = vpop.xlane.xlu0 %3477 }
0x19f5   :  { %v3482_v25 = vmul.f32 0.03125, %v3478_v23 }
0x19f6   :  { %v3485_v10 = vsub.f32 %v3473_v17, %v3483_v54 }
0x19f7   :  { %v3484_v28 = vsub.f32 %v3468_v19, %v3482_v25 }
0x19f8   :  { %v3487_v5 = vmul.f32 %v3485_v10, %v3485_v10 }
0x19f9   :  { %v3486_v29 = vmul.f32 %v3484_v28, %v3484_v28 }
0x19fa   :  { %v3491_v50 = vsel %vm153_vm0, %v3487_v5, 0.0 }
0x19fb   :  { %v3488_v30 = vsel %vm153_vm0, %v3486_v29, 0.0 }
0x19fc   :  { %3489 = vadd.xlane.f32.xlu0 %v3488_v30 }
0x1a00   :  { %3492 = vadd.xlane.f32.xlu0 %v3491_v50 }
0x1a89   :  { %v3490_v43 = vpop.xlane.xlu0 %3489 }
0x1a8a   :  { %v3494_v45 = vmul.f32 0.03125, %v3490_v43 }
0x1a8c   :  { %v3496_v47 = vadd.f32 1e-05, %v3494_v45 }
0x1a8d   :  { %v3493_v44 = vpop.xlane.xlu0 %3492 }
0x1a8e   :  { %4551 = vrsqrt.f32 %v3496_v47  ;;  %v3495_v6 = vmul.f32 0.03125, %v3493_v44 }
0x1a90   :  { %v3497_v48 = vadd.f32 1e-05, %v3495_v6 }
0x1a92   :  { %4553 = vrsqrt.f32 %v3497_v48 }
0x1a98   :  { %v4552_v27 = vpop.eup %4551 }
0x1a99   :  { %v3500_v53 = vmul.f32 %v4552_v27, %v3484_v28 }
0x1a9b   :  { %v3506_v55 = vmul.f32 %v3830_v52, %v3500_v53 }
0x1a9c   :  { %v4554_v56 = vpop.eup %4553 }
0x1a9d   :  { %v3501_v58 = vmul.f32 %v4554_v56, %v3485_v10  ;;  %v3508_v59 = vadd.f32 %v3506_v55, %v5021_v24 }
0x1a9f   :  { %v3507_v42 = vmul.f32 %v3830_v52, %v3501_v58  ;;  %v3514_v60 = vadd.f32 %v3831_v57, %v3508_v59 }
0x1aa1   :  { %v3509_v61 = vadd.f32 %v3507_v42, %v5026_v26  ;;  %4248 = vmatprep.mubr.msk.f32.mxu0 %vm153_vm0, %v3514_v60  ;;  %v3835_v26 = vld [vmem:[#allocation10 + $0xd] ss:$0 sm:$0xff] }
0x1aa3   :  { %v3515_v32 = vadd.f32 %v3831_v57, %v3509_v61 }
0x1aa5   :  { %4249 = vmatmul.mubr.msk.f32.vlgmr.msra.gmra.mrb[40].mxu0 %vm153_vm0, %v3515_v32 }
0x1b78   :  { %v4250_v13 = vpop.f32.mrb[40].mxu0 }
0x1b79   :  { %v3598_v1 = vadd.f32 %v4250_v13, %v3832_v0  ;;  %v3592_v2 = vpop.f32.mrb[41].mxu0 }
0x1b7a   :  { %v3593_v4 = vadd.f32 %v3832_v0, %v3592_v2 }
0x1b7b   :  { %v3602_v9 = vmax.f32 %v3598_v1, 0.0 }
0x1b7c   :  { %v3601_v24 = vmax.f32 %v3593_v4, 0.0 }
0x1b7e   :  { %4267 = vmatprep.mubr.msk.f32.mxu1 %vm3607_vm6, %v3601_v24 }
0x1b7f   :  { %4268 = vmatmul.mubr.msk.f32.vlgmr.msra.gmra.mrb[40].mxu1 %vm3607_vm6, %v3602_v9 }
0x1c52   :  { %v4269_v11 = vpop.f32.mrb[40].mxu1 }
0x1c53   :  { %v3686_v12 = vadd.f32 %v4269_v11, %v3835_v26  ;;  %v3680_v14 = vpop.f32.mrb[41].mxu1 }
0x1c54   :  { %v3681_v15 = vadd.f32 %v3835_v26, %v3680_v14 }
0x1c55   :  { %v3692_v16 = vsel %vm153_vm0, %v3686_v12, 0.0 }
0x1c56   :  { %3693 = vadd.xlane.f32.xlu0 %v3692_v16  ;;  %v3689_v17 = vsel %vm153_vm0, %v3681_v15, 0.0 }
0x1c57   :  { %3690 = vadd.xlane.f32.xlu1 %v3689_v17 }
0x1ce3   :  { %v3694_v18 = vpop.xlane.xlu0 %3693 }
0x1ce4   :  { %v3696_v19 = vmul.f32 0.03125, %v3694_v18  ;;  %v3691_v20 = vpop.xlane.xlu1 %3690 }
0x1ce5   :  { %v3695_v21 = vmul.f32 0.03125, %v3691_v20 }
0x1ce6   :  { %v3698_v22 = vsub.f32 %v3686_v12, %v3696_v19 }
0x1ce7   :  { %v3697_v54 = vsub.f32 %v3681_v15, %v3695_v21 }
0x1ce8   :  { %v3700_v23 = vmul.f32 %v3698_v22, %v3698_v22 }
0x1ce9   :  { %v3699_v25 = vmul.f32 %v3697_v54, %v3697_v54 }
0x1cea   :  { %v3704_v10 = vsel %vm153_vm0, %v3700_v23, 0.0 }
0x1ceb   :  { %3705 = vadd.xlane.f32.xlu0 %v3704_v10  ;;  %v3701_v28 = vsel %vm153_vm0, %v3699_v25, 0.0 }
0x1cec   :  { %3702 = vadd.xlane.f32.xlu1 %v3701_v28 }
0x1d78   :  { %v3706_v29 = vpop.xlane.xlu0 %3705 }
0x1d79   :  { %v3708_v30 = vmul.f32 0.03125, %v3706_v29  ;;  %v3703_v5 = vpop.xlane.xlu1 %3702 }
0x1d7a   :  { %v3707_v50 = vmul.f32 0.03125, %v3703_v5 }
0x1d7b   :  { %v3710_v51 = vadd.f32 1e-05, %v3708_v30 }
0x1d7c   :  { %v3709_v46 = vadd.f32 1e-05, %v3707_v50 }
0x1d7d   :  { %4555 = vrsqrt.f32 %v3710_v51 }
0x1d7e   :  { %4557 = vrsqrt.f32 %v3709_v46 }
0x1d87   :  { %v4556_v31 = vpop.eup %4555 }
0x1d88   :  { %v4558_v34 = vpop.eup %4557  ;;  %v3714_v35 = vmul.f32 %v4556_v31, %v3698_v22 }
0x1d89   :  { %v3713_v36 = vmul.f32 %v4558_v34, %v3697_v54 }
0x1d8a   :  { %v3720_v3 = vmul.f32 %v3838_v33, %v3714_v35 }
0x1d8b   :  { %v3719_v38 = vmul.f32 %v3838_v33, %v3713_v36 }
0x1d8c   :  { %v3722_v39 = vadd.f32 %v3720_v3, %v3515_v32 }
0x1d8d   :  { %v3721_v40 = vadd.f32 %v3719_v38, %v3514_v60 }
0x1d8e   :  { %v3728_v41 = vadd.f32 %v3839_v37, %v3722_v39 }
0x1d8f   :  { %v3727_v8 = vadd.f32 %v3839_v37, %v3721_v40 }
0x1d90   :  { %3730 = vst.msk [vmem:[#allocation11 + $0x8] sm:$0xff] %vm153_vm0, %v3728_v41 }
0x1d91   :  { %3729 = vst.msk [vmem:[#allocation11] sm:$0xff] %vm153_vm0, %v3727_v8 }
0x1d92   :  { %4680 = shalt.err (!%p4677_p2)
}
0x1d93   :  { %s4681_s20 = scalar_lea.hbm %s5261_s5, 256 }
0x1d94   :  { %p4682_p3 = scmp.ne.s32.totalorder %s5261_s5, %s4681_s20  ;;  %p4685_p4 = scmp.lt.u32.totalorder %s4681_s20, %s5261_s5 }
0x1d96   :  { %p4687_p5 = pnand %p4685_p4, %p4682_p3 }
0x1d98   :  { %4690 = shalt.err (!%p4687_p5)
}
0x1d99   :  { %3742 = dma.vmem_to_hbm [thread:$0]  %s3737_s1, 256, %s5261_s5, [#allocation4], %s4701_s30, %s4701_s30, %s4702_s6  }
0x1d9a   :  { %4697 = dma.done.wait [#allocation4], 256  }
0x1d9b   :  { %4698 = vsyncadd [#allocation4], 4294967040 }
0x1d9c   :  { %3746 = vsyncpa [#allocation3], 1 }
0x1d9d   :  { %3747 = vsyncpa [#allocation6], 1 }
0x1d9e   :  { %3748 = vsyncpa [#allocation9], 1 }
0x1d9f   :  { %3749 = vsyncpa [#allocation4], 1 }

</bundles_post_ra>
